<compile_context>
chip_gen: v6e
topology: v6e:2x2x1
jax: 0.10.0
libtpu: 0.0.40
codegen_flags: <defaults>
</compile_context>

<pallas_src>
import functools

import numpy as np
import jax
import jax.numpy as jnp
from jax.experimental import pallas as pl
from jax.experimental.pallas import tpu as pltpu

_LANE = 128
_VMEM_LIMIT = 32 * 1024 * 1024


def _round_up(x, m):
    return (x + m - 1) // m * m


# ---------------------------------------------------------------------------
# Fused forward kernel (variable number of encoder / decoder layers)
# ---------------------------------------------------------------------------
def _make_vae_kernel(n_enc, n_dec, lp):
    """Kernel refs: x, eps, [w,b]*n_enc, w_head, b_head, w_dec_in, b_dec_in,
    [w,b]*n_dec, mu_out, logvar_out, recon_out."""

    def kernel(*refs):
        it = iter(refs)
        x_ref, eps_ref = next(it), next(it)
        enc = [(next(it), next(it)) for _ in range(n_enc)]
        wh_ref, bh_ref = next(it), next(it)
        wd_ref, bd_ref = next(it), next(it)
        dec = [(next(it), next(it)) for _ in range(n_dec)]
        mu_ref, lv_ref, xr_ref = next(it), next(it), next(it)

        def gemm(a, w_ref, b_ref):
            # bf16 MXU matmul, f32 accumulation, fused bias add
            return jnp.dot(a.astype(jnp.bfloat16), w_ref[...],
                           preferred_element_type=jnp.float32) + b_ref[...]

        # ---- encoder: Conv2d(k=4, s=2, p=1) + ReLU, as dense operators ----
        h = x_ref[...]
        for w_ref, b_ref in enc:
            h = jnp.maximum(gemm(h, w_ref, b_ref), 0.0)

        # ---- fused [mu | logvar] head + reparameterization ----------------
        r = gemm(h, wh_ref, bh_ref)          # (tm, 2*lp): [mu | logvar]
        mu = r[:, :lp]
        lv = r[:, lp:]
        mu_ref[...] = mu
        lv_ref[...] = lv
        z = mu + eps_ref[...] * jnp.exp(0.5 * lv)

        # ---- decoder_input linear + ConvTranspose2d chain ------------------
        d = gemm(z, wd_ref, bd_ref)          # no activation after decoder_input
        for li, (w_ref, b_ref) in enumerate(dec):
            d = gemm(d, w_ref, b_ref)
            d = jnp.tanh(d) if li == n_dec - 1 else jnp.maximum(d, 0.0)
        xr_ref[...] = d

    return kernel


# ---------------------------------------------------------------------------
# Forward pass wrapper (matches torch VAE.forward: returns x_recon, x, mu, logvar)
# ---------------------------------------------------------------------------
def vae_forward(params, x_nchw, eps, *, input_channels, image_size, latent_dims,
                channels):
    B = x_nchw.shape[0]
    n_enc = len(channels)
    n_dec = len(channels)
    lp = _round_up(latent_dims, _LANE)

    din = input_channels * image_size * image_size
    din_p = _round_up(din, _LANE)
    hw = image_size // 2 ** n_enc
    hw *= 2 ** (n_dec - 1)
    out_hw = 2 * hw + 4                      # final layer: stride 2, pad 0, opad 2
    dout = input_channels * out_hw * out_hw
    dout_p = _round_up(dout, _LANE)

    mp = _round_up(B, 8)
    tm = mp if mp <= 128 else 128            # batch tile; >=2 blocks shard v7x's 2 TCs
    mp = _round_up(mp, tm)

    # One-time boundary pad / cast (the only XLA glue in the whole forward).
    xf = jnp.pad(x_nchw.reshape(B, din).astype(jnp.bfloat16),
                 ((0, mp - B), (0, din_p - din)))
    epsf = jnp.pad(eps.astype(jnp.float32),
                   ((0, mp - B), (0, lp - latent_dims)))

    weights = params["gemm"]                 # (w, b) pairs, pre-padded & bf16/f32
    const_specs = [pl.BlockSpec(w.shape, lambda i: (0, 0)) for w in weights]

    mu, lv, xr = pl.pallas_call(
        _make_vae_kernel(n_enc, n_dec, lp),
        out_shape=(jax.ShapeDtypeStruct((mp, lp), jnp.float32),
                   jax.ShapeDtypeStruct((mp, lp), jnp.float32),
                   jax.ShapeDtypeStruct((mp, dout_p), jnp.float32)),
        grid=(mp // tm,),
        in_specs=[pl.BlockSpec((tm, din_p), lambda i: (i, 0)),
                  pl.BlockSpec((tm, lp), lambda i: (i, 0))] + const_specs,
        out_specs=(pl.BlockSpec((tm, lp), lambda i: (i, 0)),
                   pl.BlockSpec((tm, lp), lambda i: (i, 0)),
                   pl.BlockSpec((tm, dout_p), lambda i: (i, 0))),
        compiler_params=pltpu.CompilerParams(
            dimension_semantics=("parallel",),
            vmem_limit_bytes=_VMEM_LIMIT),
    )(xf, epsf, *weights)

    mu = mu[:B, :latent_dims]
    logvar = lv[:B, :latent_dims]
    x_recon = xr[:B, :dout].reshape(B, input_channels, out_hw, out_hw)
    return x_recon, x_nchw, mu, logvar


# ---------------------------------------------------------------------------
# Parameters: torch-layout init + one-time lowering to dense GEMM operators
# ---------------------------------------------------------------------------
def init_params(key, input_channels, image_size, latent_dims, channels):
    keys = iter(jax.random.split(key, 64))

    def uni(k, shape, fan_in):
        bound = 1.0 / float(fan_in) ** 0.5
        return jax.random.uniform(k, shape, jnp.float32, -bound, bound)

    params = {}
    enc, cin = [], input_channels
    for ch in channels:
        enc.append((uni(next(keys), (ch, cin, 4, 4), cin * 16),
                    uni(next(keys), (ch,), cin * 16)))
        cin = ch
    params["encoder"] = enc

    conv_out = image_size // 2 ** len(channels)
    flat = channels[-1] * conv_out * conv_out
    params["mu_w"] = uni(next(keys), (latent_dims, flat), flat)
    params["mu_b"] = uni(next(keys), (latent_dims,), flat)
    params["lv_w"] = uni(next(keys), (latent_dims, flat), flat)
    params["lv_b"] = uni(next(keys), (latent_dims,), flat)
    params["dec_in_w"] = uni(next(keys), (flat, latent_dims), latent_dims)
    params["dec_in_b"] = uni(next(keys), (flat,), latent_dims)

    dec, rev = [], list(reversed(channels))
    cin = rev[0]
    for ch in rev[1:]:
        dec.append((uni(next(keys), (cin, ch, 4, 4), cin * 16),
                    uni(next(keys), (ch,), cin * 16)))
        cin = ch
    dec.append((uni(next(keys), (cin, input_channels, 4, 4), cin * 16),
                uni(next(keys), (input_channels,), cin * 16)))
    params["decoder"] = dec
    return params


def _conv_s2_operator(w, b, H, W):
    """torch Conv2d weight (Cout,Cin,4,4), stride 2, padding 1 -> dense
    (H*W*Cin, OH*OW*Cout) operator on NHWC-flat activations + bias vector."""
    cout, cin = w.shape[0], w.shape[1]
    OH, OW = H // 2, W // 2
    m = np.zeros((H, W, cin, OH, OW, cout), np.float32)
    wt = np.transpose(w, (1, 0, 2, 3))            # (Cin, Cout, ky, kx)
    for oy in range(OH):
        for ox in range(OW):
            for ky in range(4):
                for kx in range(4):
                    iy, ix = 2 * oy + ky - 1, 2 * ox + kx - 1
                    if 0 <= iy < H and 0 <= ix < W:
                        m[iy, ix, :, oy, ox, :] += wt[:, :, ky, kx]
    bias = np.broadcast_to(b, (OH * OW, cout)).reshape(-1).copy()
    return m.reshape(H * W * cin, OH * OW * cout), bias, (OH, OW, cout)


def _convT_s2_operator(w, b, H, W, padding, output_padding):
    """torch ConvTranspose2d weight (Cin,Cout,4,4), stride 2 -> dense operator.

    out[oy,ox] = bias + sum over (iy,ky): oy = 2*iy - padding + ky (same for x).
    Output size (H-1)*2 - 2*padding + 4 + output_padding; positions beyond the
    kernel's reach receive bias only.
    """
    cin, cout = w.shape[0], w.shape[1]
    OH = (H - 1) * 2 - 2 * padding + 4 + output_padding
    OW = (W - 1) * 2 - 2 * padding + 4 + output_padding
    m = np.zeros((H, W, cin, OH, OW, cout), np.float32)
    for iy in range(H):
        for ix in range(W):
            for ky in range(4):
                for kx in range(4):
                    oy, ox = 2 * iy - padding + ky, 2 * ix - padding + kx
                    if 0 <= oy < OH and 0 <= ox < OW:
                        m[iy, ix, :, oy, ox, :] += w[:, :, ky, kx]
    bias = np.broadcast_to(b, (OH * OW, cout)).reshape(-1).copy()
    return m.reshape(H * W * cin, OH * OW * cout), bias, (OH, OW, cout)


def prepare_params(raw, input_channels, image_size, latent_dims, channels):
    """One-time lowering of torch-layout params to padded, VMEM-ready GEMM operators."""
    lp = _round_up(latent_dims, _LANE)
    gemm_list = []

    def add(mat, bias):
        k, n = mat.shape
        kp, npd = _round_up(k, _LANE), _round_up(n, _LANE)
        wpad = np.zeros((kp, npd), np.float32)
        wpad[:k, :n] = mat
        bpad = np.zeros((1, npd), np.float32)
        bpad[0, :n] = bias
        gemm_list.append(jnp.asarray(wpad, jnp.bfloat16))
        gemm_list.append(jnp.asarray(bpad, jnp.float32))

    # --- encoder convs ------------------------------------------------------
    H = W = image_size
    cin = input_channels
    for li, (w, b) in enumerate(raw["encoder"]):
        w, b = np.asarray(w), np.asarray(b)
        mat, bias, (OH, OW, cout) = _conv_s2_operator(w, b, H, W)
        if li == 0:
            # fold the NCHW -> NHWC flatten permutation of the network input
            p = np.arange(H * W * cin).reshape(H, W, cin).transpose(2, 0, 1).reshape(-1)
            mat = mat[p]
        add(mat, bias)
        H, W, cin = OH, OW, cout

    conv_out, c_last = H, cin
    flat = c_last * conv_out * conv_out
    # NHWC-flat index -> NCHW (torch) flat index of the encoder feature map
    p2 = np.arange(flat).reshape(c_last, conv_out, conv_out).transpose(1, 2, 0).reshape(-1)

    # --- fused [mu | logvar] head: columns [0:lp) mu, [lp:2lp) logvar --------
    wh = np.zeros((flat, 2 * lp), np.float32)
    bh = np.zeros(2 * lp, np.float32)
    wh[:, :latent_dims] = np.asarray(raw["mu_w"]).T[p2]
    wh[:, lp:lp + latent_dims] = np.asarray(raw["lv_w"]).T[p2]
    bh[:latent_dims] = np.asarray(raw["mu_b"])
    bh[lp:lp + latent_dims] = np.asarray(raw["lv_b"])
    add(wh, bh)

    # --- decoder_input linear, outputs permuted to NHWC-flat order -----------
    wd = np.asarray(raw["dec_in_w"]).T[:, p2]        # (latent, flat_hwc)
    bd = np.asarray(raw["dec_in_b"])[p2]
    add(wd, bd)

    # --- decoder transposed convs --------------------------------------------
    H = W = conv_out
    rev = list(reversed(channels))
    outs = rev[1:] + [input_channels]
    n_dec = len(outs)
    for li, ((w, b), cout) in enumerate(zip(raw["decoder"], outs)):
        w, b = np.asarray(w), np.asarray(b)
        last = li == n_dec - 1
        pad, opad = (0, 2) if last else (1, 0)
        mat, bias, (OH, OW, _) = _convT_s2_operator(w, b, H, W, pad, opad)
        if last:
            # fold the NHWC -> NCHW flatten permutation of the network output
            p = np.arange(OH * OW * cout).reshape(OH, OW, cout).transpose(2, 0, 1).reshape(-1)
            mat = mat[:, p]
            bias = bias[p]
        add(mat, bias)
        H, W = OH, OW

    return {"gemm": tuple(gemm_list)}


# ---------------------------------------------------------------------------
# Pure-JAX f32 reference (validation only; not part of the Pallas forward)
# ---------------------------------------------------------------------------
def vae_reference(raw, x, eps, *, image_size, channels):
    h = x
    for w, b in raw["encoder"]:
        h = jax.lax.conv_general_dilated(
            h, w, window_strides=(2, 2), padding=((1, 1), (1, 1)),
            dimension_numbers=("NCHW", "OIHW", "NCHW"))
        h = jnp.maximum(h + b.reshape(1, -1, 1, 1), 0.0)
    B = x.shape[0]
    hf = h.reshape(B, -1)
    mu = hf @ raw["mu_w"].T + raw["mu_b"]
    logvar = hf @ raw["lv_w"].T + raw["lv_b"]
    z = mu + eps * jnp.exp(0.5 * logvar)
    d = z @ raw["dec_in_w"].T + raw["dec_in_b"]
    conv_out = image_size // 2 ** len(channels)
    d = d.reshape(B, channels[-1], conv_out, conv_out)
    n_dec = len(raw["decoder"])
    for li, (w, b) in enumerate(raw["decoder"]):
        last = li == n_dec - 1
        p, op = (0, 2) if last else (1, 0)
        w_corr = jnp.flip(w, (2, 3)).transpose(1, 0, 2, 3)
        d = jax.lax.conv_general_dilated(
            d, w_corr, window_strides=(1, 1),
            padding=((3 - p, 3 - p + op), (3 - p, 3 - p + op)),
            lhs_dilation=(2, 2),
            dimension_numbers=("NCHW", "OIHW", "NCHW"))
        d = d + b.reshape(1, -1, 1, 1)
        d = jnp.tanh(d) if last else jnp.maximum(d, 0.0)
    return d, mu, logvar


if __name__ == "__main__":
    # small config consistent with the module: VAE(1, 16, 8, [8, 16])
    input_channels, image_size, latent_dims = 1, 16, 8
    channels = (8, 16)
    batch = 2

    key = jax.random.PRNGKey(0)
    k_param, k_x, k_eps = jax.random.split(key, 3)
    raw = init_params(k_param, input_channels, image_size, latent_dims, channels)
    params = prepare_params(raw, input_channels, image_size, latent_dims, channels)

    x = jax.random.normal(k_x, (batch, input_channels, image_size, image_size),
                          jnp.float32)
    # TODO(synk): torch.randn_like inside reparameterize is stateful; the noise is
    # drawn deterministically here and fed to the fused kernel as `eps`.
    eps = jax.random.normal(k_eps, (batch, latent_dims), jnp.float32)

    fwd = jax.jit(functools.partial(
        vae_forward, input_channels=input_channels, image_size=image_size,
        latent_dims=latent_dims, channels=channels))
    x_recon, x_out, mu, logvar = fwd(params, x, eps)
    jax.block_until_ready((x_recon, x_out, mu, logvar))

    hw = (image_size // 2 ** len(channels)) * 2 ** (len(channels) - 1)
    out_hw = 2 * hw + 4
    assert x_recon.shape == (batch, input_channels, out_hw, out_hw)
    assert mu.shape == (batch, latent_dims) and logvar.shape == (batch, latent_dims)

    # element-wise validation against the pure-JAX f32 reference
    ref_recon, ref_mu, ref_lv = vae_reference(raw, x, eps, image_size=image_size,
                                              channels=channels)
    np.testing.assert_allclose(np.asarray(mu), np.asarray(ref_mu),
                               rtol=5e-2, atol=5e-2)
    np.testing.assert_allclose(np.asarray(logvar), np.asarray(ref_lv),
                               rtol=5e-2, atol=5e-2)
    np.testing.assert_allclose(np.asarray(x_recon), np.asarray(ref_recon),
                               rtol=5e-2, atol=5e-2)

    print("KERNEL_OK")
</pallas_src>

<mosaic_0001>
module attributes {stable_mosaic.version = 11 : i64} {
  func.func @kernel(%arg0: i32, %arg1: memref<8x256xbf16, #tpu.memory_space<vmem>>, %arg2: memref<8x128xf32, #tpu.memory_space<vmem>>, %arg3: memref<256x512xbf16, #tpu.memory_space<vmem>>, %arg4: memref<1x512xf32, #tpu.memory_space<vmem>>, %arg5: memref<512x256xbf16, #tpu.memory_space<vmem>>, %arg6: memref<1x256xf32, #tpu.memory_space<vmem>>, %arg7: memref<256x256xbf16, #tpu.memory_space<vmem>>, %arg8: memref<1x256xf32, #tpu.memory_space<vmem>>, %arg9: memref<128x256xbf16, #tpu.memory_space<vmem>>, %arg10: memref<1x256xf32, #tpu.memory_space<vmem>>, %arg11: memref<256x512xbf16, #tpu.memory_space<vmem>>, %arg12: memref<1x512xf32, #tpu.memory_space<vmem>>, %arg13: memref<512x512xbf16, #tpu.memory_space<vmem>>, %arg14: memref<1x512xf32, #tpu.memory_space<vmem>>, %arg15: memref<8x128xf32, #tpu.memory_space<vmem>>, %arg16: memref<8x128xf32, #tpu.memory_space<vmem>>, %arg17: memref<8x512xf32, #tpu.memory_space<vmem>>) attributes {dimension_semantics = [#tpu.dimension_semantics<parallel>], iteration_bounds = array<i64: 1>, scalar_prefetch = 0 : i64, scratch_operands = 0 : i64, tpu.core_type = #tpu.core_type<tc>, window_params = [{transform_indices = @transform_0, window_bounds = array<i64: 8, 256>}, {transform_indices = @transform_1, window_bounds = array<i64: 8, 128>}, {pipeline_mode = #tpu.pipeline_mode<synchronous>, transform_indices = @transform_2, window_bounds = array<i64: 256, 512>}, {pipeline_mode = #tpu.pipeline_mode<synchronous>, transform_indices = @transform_3, window_bounds = array<i64: 1, 512>}, {pipeline_mode = #tpu.pipeline_mode<synchronous>, transform_indices = @transform_4, window_bounds = array<i64: 512, 256>}, {pipeline_mode = #tpu.pipeline_mode<synchronous>, transform_indices = @transform_5, window_bounds = array<i64: 1, 256>}, {pipeline_mode = #tpu.pipeline_mode<synchronous>, transform_indices = @transform_6, window_bounds = array<i64: 256, 256>}, {pipeline_mode = #tpu.pipeline_mode<synchronous>, transform_indices = @transform_7, window_bounds = array<i64: 1, 256>}, {pipeline_mode = #tpu.pipeline_mode<synchronous>, transform_indices = @transform_8, window_bounds = array<i64: 128, 256>}, {pipeline_mode = #tpu.pipeline_mode<synchronous>, transform_indices = @transform_9, window_bounds = array<i64: 1, 256>}, {pipeline_mode = #tpu.pipeline_mode<synchronous>, transform_indices = @transform_10, window_bounds = array<i64: 256, 512>}, {pipeline_mode = #tpu.pipeline_mode<synchronous>, transform_indices = @transform_11, window_bounds = array<i64: 1, 512>}, {pipeline_mode = #tpu.pipeline_mode<synchronous>, transform_indices = @transform_12, window_bounds = array<i64: 512, 512>}, {pipeline_mode = #tpu.pipeline_mode<synchronous>, transform_indices = @transform_13, window_bounds = array<i64: 1, 512>}, {transform_indices = @transform_14, window_bounds = array<i64: 8, 128>}, {transform_indices = @transform_15, window_bounds = array<i64: 8, 128>}, {transform_indices = @transform_16, window_bounds = array<i64: 8, 512>}]} {
    %c0 = arith.constant 0 : index
    %c0_0 = arith.constant 0 : index
    %0 = vector.load %arg1[%c0, %c0_0] : memref<8x256xbf16, #tpu.memory_space<vmem>>, vector<8x256xbf16>
    %c0_1 = arith.constant 0 : index
    %c0_2 = arith.constant 0 : index
    %1 = vector.load %arg3[%c0_1, %c0_2] : memref<256x512xbf16, #tpu.memory_space<vmem>>, vector<256x512xbf16>
    %cst = arith.constant dense<0.000000e+00> : vector<8x512xf32>
    %2 = tpu.matmul %0, %1, %cst {dimension_numbers = #tpu.dot_dimension_numbers<[1], [0], [0], [1], [0, 0, 1, 1], [], []>} : vector<8x256xbf16>, vector<256x512xbf16>, vector<8x512xf32> -> vector<8x512xf32>
    %c0_3 = arith.constant 0 : index
    %c0_4 = arith.constant 0 : index
    %3 = vector.load %arg4[%c0_3, %c0_4] : memref<1x512xf32, #tpu.memory_space<vmem>>, vector<1x512xf32>
    %4 = vector.broadcast %3 : vector<1x512xf32> to vector<8x512xf32>
    %5 = arith.addf %2, %4 : vector<8x512xf32>
    %cst_5 = arith.constant 0.000000e+00 : f32
    %6 = vector.broadcast %cst_5 : f32 to vector<8x512xf32>
    %7 = arith.maximumf %5, %6 : vector<8x512xf32>
    %8 = arith.truncf %7 : vector<8x512xf32> to vector<8x512xbf16>
    %c0_6 = arith.constant 0 : index
    %c0_7 = arith.constant 0 : index
    %9 = vector.load %arg5[%c0_6, %c0_7] : memref<512x256xbf16, #tpu.memory_space<vmem>>, vector<512x256xbf16>
    %cst_8 = arith.constant dense<0.000000e+00> : vector<8x256xf32>
    %10 = tpu.matmul %8, %9, %cst_8 {dimension_numbers = #tpu.dot_dimension_numbers<[1], [0], [0], [1], [0, 0, 1, 1], [], []>} : vector<8x512xbf16>, vector<512x256xbf16>, vector<8x256xf32> -> vector<8x256xf32>
    %c0_9 = arith.constant 0 : index
    %c0_10 = arith.constant 0 : index
    %11 = vector.load %arg6[%c0_9, %c0_10] : memref<1x256xf32, #tpu.memory_space<vmem>>, vector<1x256xf32>
    %12 = vector.broadcast %11 : vector<1x256xf32> to vector<8x256xf32>
    %13 = arith.addf %10, %12 : vector<8x256xf32>
    %cst_11 = arith.constant 0.000000e+00 : f32
    %14 = vector.broadcast %cst_11 : f32 to vector<8x256xf32>
    %15 = arith.maximumf %13, %14 : vector<8x256xf32>
    %16 = arith.truncf %15 : vector<8x256xf32> to vector<8x256xbf16>
    %c0_12 = arith.constant 0 : index
    %c0_13 = arith.constant 0 : index
    %17 = vector.load %arg7[%c0_12, %c0_13] : memref<256x256xbf16, #tpu.memory_space<vmem>>, vector<256x256xbf16>
    %cst_14 = arith.constant dense<0.000000e+00> : vector<8x256xf32>
    %18 = tpu.matmul %16, %17, %cst_14 {dimension_numbers = #tpu.dot_dimension_numbers<[1], [0], [0], [1], [0, 0, 1, 1], [], []>} : vector<8x256xbf16>, vector<256x256xbf16>, vector<8x256xf32> -> vector<8x256xf32>
    %c0_15 = arith.constant 0 : index
    %c0_16 = arith.constant 0 : index
    %19 = vector.load %arg8[%c0_15, %c0_16] : memref<1x256xf32, #tpu.memory_space<vmem>>, vector<1x256xf32>
    %20 = vector.broadcast %19 : vector<1x256xf32> to vector<8x256xf32>
    %21 = arith.addf %18, %20 : vector<8x256xf32>
    %22 = vector.extract_strided_slice %21 {offsets = [0, 0], sizes = [8, 128], strides = [1, 1]} : vector<8x256xf32> to vector<8x128xf32>
    %23 = vector.extract_strided_slice %21 {offsets = [0, 128], sizes = [8, 128], strides = [1, 1]} : vector<8x256xf32> to vector<8x128xf32>
    %c0_17 = arith.constant 0 : index
    %c0_18 = arith.constant 0 : index
    %24 = vector.load %arg15[%c0_17, %c0_18] : memref<8x128xf32, #tpu.memory_space<vmem>>, vector<8x128xf32>
    tpu.vector_store %arg15[%c0_17, %c0_18], %22 {strides = array<i32>} : memref<8x128xf32, #tpu.memory_space<vmem>>, vector<8x128xf32>,
    %c0_19 = arith.constant 0 : index
    %c0_20 = arith.constant 0 : index
    %25 = vector.load %arg16[%c0_19, %c0_20] : memref<8x128xf32, #tpu.memory_space<vmem>>, vector<8x128xf32>
    tpu.vector_store %arg16[%c0_19, %c0_20], %23 {strides = array<i32>} : memref<8x128xf32, #tpu.memory_space<vmem>>, vector<8x128xf32>,
    %c0_21 = arith.constant 0 : index
    %c0_22 = arith.constant 0 : index
    %26 = vector.load %arg2[%c0_21, %c0_22] : memref<8x128xf32, #tpu.memory_space<vmem>>, vector<8x128xf32>
    %cst_23 = arith.constant 5.000000e-01 : f32
    %27 = vector.broadcast %cst_23 : f32 to vector<8x128xf32>
    %28 = arith.mulf %27, %23 : vector<8x128xf32>
    %29 = math.exp %28 : vector<8x128xf32>
    %30 = arith.mulf %26, %29 : vector<8x128xf32>
    %31 = arith.addf %22, %30 : vector<8x128xf32>
    %32 = arith.truncf %31 : vector<8x128xf32> to vector<8x128xbf16>
    %c0_24 = arith.constant 0 : index
    %c0_25 = arith.constant 0 : index
    %33 = vector.load %arg9[%c0_24, %c0_25] : memref<128x256xbf16, #tpu.memory_space<vmem>>, vector<128x256xbf16>
    %cst_26 = arith.constant dense<0.000000e+00> : vector<8x256xf32>
    %34 = tpu.matmul %32, %33, %cst_26 {dimension_numbers = #tpu.dot_dimension_numbers<[1], [0], [0], [1], [0, 0, 1, 1], [], []>} : vector<8x128xbf16>, vector<128x256xbf16>, vector<8x256xf32> -> vector<8x256xf32>
    %c0_27 = arith.constant 0 : index
    %c0_28 = arith.constant 0 : index
    %35 = vector.load %arg10[%c0_27, %c0_28] : memref<1x256xf32, #tpu.memory_space<vmem>>, vector<1x256xf32>
    %36 = vector.broadcast %35 : vector<1x256xf32> to vector<8x256xf32>
    %37 = arith.addf %34, %36 : vector<8x256xf32>
    %38 = arith.truncf %37 : vector<8x256xf32> to vector<8x256xbf16>
    %c0_29 = arith.constant 0 : index
    %c0_30 = arith.constant 0 : index
    %39 = vector.load %arg11[%c0_29, %c0_30] : memref<256x512xbf16, #tpu.memory_space<vmem>>, vector<256x512xbf16>
    %cst_31 = arith.constant dense<0.000000e+00> : vector<8x512xf32>
    %40 = tpu.matmul %38, %39, %cst_31 {dimension_numbers = #tpu.dot_dimension_numbers<[1], [0], [0], [1], [0, 0, 1, 1], [], []>} : vector<8x256xbf16>, vector<256x512xbf16>, vector<8x512xf32> -> vector<8x512xf32>
    %c0_32 = arith.constant 0 : index
    %c0_33 = arith.constant 0 : index
    %41 = vector.load %arg12[%c0_32, %c0_33] : memref<1x512xf32, #tpu.memory_space<vmem>>, vector<1x512xf32>
    %42 = vector.broadcast %41 : vector<1x512xf32> to vector<8x512xf32>
    %43 = arith.addf %40, %42 : vector<8x512xf32>
    %cst_34 = arith.constant 0.000000e+00 : f32
    %44 = vector.broadcast %cst_34 : f32 to vector<8x512xf32>
    %45 = arith.maximumf %43, %44 : vector<8x512xf32>
    %46 = arith.truncf %45 : vector<8x512xf32> to vector<8x512xbf16>
    %c0_35 = arith.constant 0 : index
    %c0_36 = arith.constant 0 : index
    %47 = vector.load %arg13[%c0_35, %c0_36] : memref<512x512xbf16, #tpu.memory_space<vmem>>, vector<512x512xbf16>
    %cst_37 = arith.constant dense<0.000000e+00> : vector<8x512xf32>
    %48 = tpu.matmul %46, %47, %cst_37 {dimension_numbers = #tpu.dot_dimension_numbers<[1], [0], [0], [1], [0, 0, 1, 1], [], []>} : vector<8x512xbf16>, vector<512x512xbf16>, vector<8x512xf32> -> vector<8x512xf32>
    %c0_38 = arith.constant 0 : index
    %c0_39 = arith.constant 0 : index
    %49 = vector.load %arg14[%c0_38, %c0_39] : memref<1x512xf32, #tpu.memory_space<vmem>>, vector<1x512xf32>
    %50 = vector.broadcast %49 : vector<1x512xf32> to vector<8x512xf32>
    %51 = arith.addf %48, %50 : vector<8x512xf32>
    %52 = math.tanh %51 : vector<8x512xf32>
    %c0_40 = arith.constant 0 : index
    %c0_41 = arith.constant 0 : index
    %53 = vector.load %arg17[%c0_40, %c0_41] : memref<8x512xf32, #tpu.memory_space<vmem>>, vector<8x512xf32>
    tpu.vector_store %arg17[%c0_40, %c0_41], %52 {strides = array<i32>} : memref<8x512xf32, #tpu.memory_space<vmem>>, vector<8x512xf32>,
    return
  }
  func.func @transform_0(%arg0: i32) -> (i32, i32) {
    %c0_i32 = arith.constant 0 : i32
    %c0_i32_0 = arith.constant 0 : i32
    return %arg0, %c0_i32 : i32, i32
  }
  func.func @transform_1(%arg0: i32) -> (i32, i32) {
    %c0_i32 = arith.constant 0 : i32
    %c0_i32_0 = arith.constant 0 : i32
    return %arg0, %c0_i32 : i32, i32
  }
  func.func @transform_2(%arg0: i32) -> (i32, i32) {
    %c0_i32 = arith.constant 0 : i32
    %c0_i32_0 = arith.constant 0 : i32
    %c0_i32_1 = arith.constant 0 : i32
    return %c0_i32, %c0_i32_0 : i32, i32
  }
  func.func @transform_3(%arg0: i32) -> (i32, i32) {
    %c0_i32 = arith.constant 0 : i32
    %c0_i32_0 = arith.constant 0 : i32
    %c0_i32_1 = arith.constant 0 : i32
    return %c0_i32, %c0_i32_0 : i32, i32
  }
  func.func @transform_4(%arg0: i32) -> (i32, i32) {
    %c0_i32 = arith.constant 0 : i32
    %c0_i32_0 = arith.constant 0 : i32
    %c0_i32_1 = arith.constant 0 : i32
    return %c0_i32, %c0_i32_0 : i32, i32
  }
  func.func @transform_5(%arg0: i32) -> (i32, i32) {
    %c0_i32 = arith.constant 0 : i32
    %c0_i32_0 = arith.constant 0 : i32
    %c0_i32_1 = arith.constant 0 : i32
    return %c0_i32, %c0_i32_0 : i32, i32
  }
  func.func @transform_6(%arg0: i32) -> (i32, i32) {
    %c0_i32 = arith.constant 0 : i32
    %c0_i32_0 = arith.constant 0 : i32
    %c0_i32_1 = arith.constant 0 : i32
    return %c0_i32, %c0_i32_0 : i32, i32
  }
  func.func @transform_7(%arg0: i32) -> (i32, i32) {
    %c0_i32 = arith.constant 0 : i32
    %c0_i32_0 = arith.constant 0 : i32
    %c0_i32_1 = arith.constant 0 : i32
    return %c0_i32, %c0_i32_0 : i32, i32
  }
  func.func @transform_8(%arg0: i32) -> (i32, i32) {
    %c0_i32 = arith.constant 0 : i32
    %c0_i32_0 = arith.constant 0 : i32
    %c0_i32_1 = arith.constant 0 : i32
    return %c0_i32, %c0_i32_0 : i32, i32
  }
  func.func @transform_9(%arg0: i32) -> (i32, i32) {
    %c0_i32 = arith.constant 0 : i32
    %c0_i32_0 = arith.constant 0 : i32
    %c0_i32_1 = arith.constant 0 : i32
    return %c0_i32, %c0_i32_0 : i32, i32
  }
  func.func @transform_10(%arg0: i32) -> (i32, i32) {
    %c0_i32 = arith.constant 0 : i32
    %c0_i32_0 = arith.constant 0 : i32
    %c0_i32_1 = arith.constant 0 : i32
    return %c0_i32, %c0_i32_0 : i32, i32
  }
  func.func @transform_11(%arg0: i32) -> (i32, i32) {
    %c0_i32 = arith.constant 0 : i32
    %c0_i32_0 = arith.constant 0 : i32
    %c0_i32_1 = arith.constant 0 : i32
    return %c0_i32, %c0_i32_0 : i32, i32
  }
  func.func @transform_12(%arg0: i32) -> (i32, i32) {
    %c0_i32 = arith.constant 0 : i32
    %c0_i32_0 = arith.constant 0 : i32
    %c0_i32_1 = arith.constant 0 : i32
    return %c0_i32, %c0_i32_0 : i32, i32
  }
  func.func @transform_13(%arg0: i32) -> (i32, i32) {
    %c0_i32 = arith.constant 0 : i32
    %c0_i32_0 = arith.constant 0 : i32
    %c0_i32_1 = arith.constant 0 : i32
    return %c0_i32, %c0_i32_0 : i32, i32
  }
  func.func @transform_14(%arg0: i32) -> (i32, i32) {
    %c0_i32 = arith.constant 0 : i32
    %c0_i32_0 = arith.constant 0 : i32
    return %arg0, %c0_i32 : i32, i32
  }
  func.func @transform_15(%arg0: i32) -> (i32, i32) {
    %c0_i32 = arith.constant 0 : i32
    %c0_i32_0 = arith.constant 0 : i32
    return %arg0, %c0_i32 : i32, i32
  }
  func.func @transform_16(%arg0: i32) -> (i32, i32) {
    %c0_i32 = arith.constant 0 : i32
    %c0_i32_0 = arith.constant 0 : i32
    return %arg0, %c0_i32 : i32, i32
  }
}

</mosaic_0001>

<bundles_post_ra>
// kernel: vae_forward.1
= control target key start
LH: loop header
LB: loop body
LE: loop exit
PB: predicated region body
PF: predicated region fallthrough
CT: control target
= control target key end

     0   :  { %s4279_s0 = inlined_call_operand.vmem [shape: bf16[8,256], index: 0, kind: input, shape index: {}]   ;;  %s4280_s1 = inlined_call_operand.vmem [shape: f32[8,128], index: 1, kind: input, shape index: {}]   ;;  %s4281_s2 = inlined_call_operand.hbm [shape: bf16[256,512], index: 2, kind: input, shape index: {}]   ;;  %s4282_s3 = inlined_call_operand.vmem [shape: f32[1,512], index: 3, kind: input, shape index: {}]   ;;  %s4283_s4 = inlined_call_operand.hbm [shape: bf16[512,256], index: 4, kind: input, shape index: {}]   ;;  %s4284_s5 = inlined_call_operand.vmem [shape: f32[1,256], index: 5, kind: input, shape index: {}]   ;;  %s4285_s6 = inlined_call_operand.hbm [shape: bf16[256,256], index: 6, kind: input, shape index: {}]   ;;  %s4286_s7 = inlined_call_operand.vmem [shape: f32[1,256], index: 7, kind: input, shape index: {}]   ;;  %s4287_s8 = inlined_call_operand.hbm [shape: bf16[128,256], index: 8, kind: input, shape index: {}]   ;;  %s4288_s9 = inlined_call_operand.vmem [shape: f32[1,256], index: 9, kind: input, shape index: {}]   ;;  %s4289_s10 = inlined_call_operand.hbm [shape: bf16[256,512], index: 10, kind: input, shape index: {}]   ;;  %s4290_s11 = inlined_call_operand.vmem [shape: f32[1,512], index: 11, kind: input, shape index: {}]   ;;  %s4291_s12 = inlined_call_operand.hbm [shape: bf16[512,512], index: 12, kind: input, shape index: {}]   ;;  %s4292_s13 = inlined_call_operand.vmem [shape: f32[1,512], index: 13, kind: input, shape index: {}]   ;;  %s4293_s14 = inlined_call_operand.vmem [shape: f32[8,128], index: 14, kind: output, shape index: {0}]   ;;  %s4294_s15 = inlined_call_operand.vmem [shape: f32[8,128], index: 15, kind: output, shape index: {1}]   ;;  %s4295_s16 = inlined_call_operand.vmem [shape: f32[8,512], index: 16, kind: output, shape index: {2}]  }
   0x1   :  { %4296 = sst [smem:[#allocation16_spill]] %s4279_s0 }
   0x2   :  { %22 = vsyncpa [#allocation3], 0 }
   0x3   :  { %23 = vsyncpa [#allocation5], 0 }
   0x4   :  { %24 = vsyncpa [#allocation8], 0 }
   0x5   :  { %25 = vsyncpa [#allocation11], 0  ;;  %s4071_s21 = smov [#allocation4]  }
   0x6   :  { %s49_s22 = sshll.u32 %s4071_s21, 4  ;;  %s50_s22 = int_to_ptr.vmem [resolvable:$true] %s49_s22 }
   0x7   :  { %s3951_s23 = scalar_lea.vmem %s50_s22, 8192  ;;  %p3956_p1 = scmp.lt.s32.totalorder %s50_s22, %s50_s22 }
   0x8   :  { %p3952_p0 = scmp.ne.s32.totalorder %s50_s22, %s3951_s23  ;;  %p3957_p2 = scmp.lt.s32.totalorder %s3951_s23, %s3951_s23 }
   0xa   :  { %p3958_p3 = por %p3957_p2, %p3956_p1 }
   0xc   :  { %p3959_p4 = pnand %p3958_p3, %p3952_p0 }
   0xe   :  { %3962 = shalt.err (!%p3959_p4)
}
   0xf   :  { %s4072_s24 = smov 128   ;;  %s4073_s25 = smov 8  }
  0x10   :  { %55 = dma.hbm_to_vmem [thread:$0]  %s4283_s4, 8192, %s50_s22, [#allocation5], %s4072_s24, %s4072_s24, %s4073_s25  }
  0x11   :  { %s4074_s28 = smov [#allocation7]   ;;  %s4075_s30 = smov [#allocation2]  }
  0x12   :  { %s77_s29 = sshll.u32 %s4074_s28, 4  ;;  %s35_s0 = sshll.u32 %s4075_s30, 4  ;;  %s78_s29 = int_to_ptr.vmem [resolvable:$true] %s77_s29  ;;  %s36_s0 = int_to_ptr.vmem [resolvable:$true] %s35_s0 }
  0x13   :  { %s3971_s17 = scalar_lea.vmem %s78_s29, 2048  ;;  %p3976_p6 = scmp.lt.s32.totalorder %s78_s29, %s78_s29 }
  0x14   :  { %p3972_p5 = scmp.ne.s32.totalorder %s78_s29, %s3971_s17  ;;  %p3977_p7 = scmp.lt.s32.totalorder %s3971_s17, %s3971_s17 }
  0x16   :  { %p3978_p8 = por %p3977_p7, %p3976_p6 }
  0x18   :  { %p3979_p9 = pnand %p3978_p8, %p3972_p5 }
  0x1a   :  { %3982 = shalt.err (!%p3979_p9)
}
  0x1b   :  { %83 = dma.hbm_to_vmem [thread:$0]  %s4287_s8, 2048, %s78_s29, [#allocation8], %s4072_s24, %s4072_s24, %s4073_s25  }
  0x1c   :  { %s3991_s4 = scalar_lea.vmem %s36_s0, 8192  ;;  %p3996_p11 = scmp.lt.s32.totalorder %s36_s0, %s36_s0 }
  0x1d   :  { %p3992_p10 = scmp.ne.s32.totalorder %s36_s0, %s3991_s4  ;;  %p3997_p12 = scmp.lt.s32.totalorder %s3991_s4, %s3991_s4 }
  0x1f   :  { %p3998_p13 = por %p3997_p12, %p3996_p11 }
  0x21   :  { %p3999_p0 = pnand %p3998_p13, %p3992_p10 }
  0x23   :  { %4002 = shalt.err (!%p3999_p0)
}
  0x24   :  { %s4076_s20 = smov 256   ;;  %s4077_s21 = smov 16  }
  0x25   :  { %41 = dma.hbm_to_vmem [thread:$0]  %s4281_s2, 8192, %s36_s0, [#allocation3], %s4076_s20, %s4076_s20, %s4077_s21  }
  0x26   :  { %s4078_s26 = smov [#allocation6]   ;;  %s4079_s8 = smov [#allocation9]  }
  0x27   :  { %s63_s27 = sshll.u32 %s4078_s26, 4  ;;  %s91_s28 = sshll.u32 %s4079_s8, 4  ;;  %s64_s27 = int_to_ptr.vmem [resolvable:$true] %s63_s27  ;;  %s92_s28 = int_to_ptr.vmem [resolvable:$true] %s91_s28 }
  0x28   :  { %s4011_s29 = scalar_lea.vmem %s64_s27, 4096  ;;  %p4016_p2 = scmp.lt.s32.totalorder %s64_s27, %s64_s27 }
  0x29   :  { %p4012_p1 = scmp.ne.s32.totalorder %s64_s27, %s4011_s29  ;;  %p4017_p3 = scmp.lt.s32.totalorder %s4011_s29, %s4011_s29 }
  0x2b   :  { %p4018_p4 = por %p4017_p3, %p4016_p2 }
  0x2d   :  { %p4019_p5 = pnand %p4018_p4, %p4012_p1 }
  0x2f   :  { %4022 = shalt.err (!%p4019_p5)
}
  0x30   :  { %69 = dma.hbm_to_vmem [thread:$0]  %s4285_s6, 4096, %s64_s27, [#allocation5], %s4072_s24, %s4072_s24, %s4073_s25  }
  0x31   :  { %s4031_s2 = scalar_lea.vmem %s92_s28, 8192  ;;  %p4036_p7 = scmp.lt.s32.totalorder %s92_s28, %s92_s28 }
  0x32   :  { %p4032_p6 = scmp.ne.s32.totalorder %s92_s28, %s4031_s2  ;;  %p4037_p8 = scmp.lt.s32.totalorder %s4031_s2, %s4031_s2 }
  0x34   :  { %p4038_p9 = por %p4037_p8, %p4036_p7 }
  0x36   :  { %p4039_p10 = pnand %p4038_p9, %p4032_p6 }
  0x38   :  { %4042 = shalt.err (!%p4039_p10)
}
  0x39   :  { %97 = dma.hbm_to_vmem [thread:$0]  %s4289_s10, 8192, %s92_s28, [#allocation8], %s4076_s20, %s4076_s20, %s4077_s21  }
  0x3a   :  { %s4080_s19 = smov [#allocation10]  }
  0x3b   :  { %s105_s4 = sshll.u32 %s4080_s19, 4  ;;  %s106_s4 = int_to_ptr.vmem [resolvable:$true] %s105_s4 }
  0x3c   :  { %s4051_s22 = scalar_lea.vmem %s106_s4, 16384  ;;  %p4056_p12 = scmp.lt.s32.totalorder %s106_s4, %s106_s4 }
  0x3d   :  { %p4052_p11 = scmp.ne.s32.totalorder %s106_s4, %s4051_s22  ;;  %p4057_p13 = scmp.lt.s32.totalorder %s4051_s22, %s4051_s22 }
  0x3f   :  { %p4058_p0 = por %p4057_p13, %p4056_p12 }
  0x41   :  { %p4059_p1 = pnand %p4058_p0, %p4052_p11 }
  0x43   :  { %4062 = shalt.err (!%p4059_p1)
}
  0x44   :  { %111 = dma.hbm_to_vmem [thread:$0]  %s4291_s12, 16384, %s106_s4, [#allocation11], %s4076_s20, %s4076_s20, %s4077_s21  }
  0x45   :  { %4063 = dma.done.wait [#allocation3], 8192  }
  0x46   :  { %4064 = vsyncadd [#allocation3], 4294959104 }
  0x47   :  { %4065 = dma.done.wait [#allocation5], 12288  }
  0x48   :  { %4066 = vsyncadd [#allocation5], 4294955008 }
  0x49   :  { %4067 = dma.done.wait [#allocation8], 10240  }
  0x4a   :  { %4068 = vsyncadd [#allocation8], 4294957056 }
  0x4b   :  { %4069 = dma.done.wait [#allocation11], 16384  }
  0x4c   :  { %4070 = vsyncadd [#allocation11], 4294950912  ;;  %v3379_v0 = vld [vmem:[#allocation2 + $0xe4] ss:$16 sps:$4 sm:$0xff]   ;;  %v3381_v1 = vld [vmem:[#allocation2 + $0xec] ss:$16 sps:$4 sm:$0xff]  }
  0x4d   :  { %547 = vmatprep.subr.bf16.mxu0 %v3379_v0  ;;  %v3383_v2 = vld [vmem:[#allocation2 + $0xe0] ss:$16 sps:$4 sm:$0xff]   ;;  %v3384_v3 = vld [vmem:[#allocation2 + $0xe8] ss:$16 sps:$4 sm:$0xff]   ;;  %588 = vmatprep.subr.bf16.mxu1 %v3381_v1  ;;  %v3385_v4 = vld [vmem:[#allocation2 + $0xc4] ss:$16 sps:$4 sm:$0xff]  }
  0x4e   :  { %548 = vmatpush1.bf16.msra.mxu0 %v3383_v2  ;;  %589 = vmatpush1.bf16.msra.mxu1 %v3384_v3  ;;  %v3387_v5 = vld [vmem:[#allocation2 + $0xcc] ss:$16 sps:$4 sm:$0xff]   ;;  %v3389_v6 = vld [vmem:[#allocation2 + $0xc0] ss:$16 sps:$4 sm:$0xff]   ;;  %v3390_v7 = vld [vmem:[#allocation2 + $0xc8] ss:$16 sps:$4 sm:$0xff]  }
  0x4f   :  { %549 = vmatprep.subr.bf16.mxu0 %v3385_v4  ;;  %590 = vmatprep.subr.bf16.mxu1 %v3387_v5  ;;  %v3391_v8 = vld [vmem:[#allocation2 + $0xa4] ss:$16 sps:$4 sm:$0xff]   ;;  %v3393_v9 = vld [vmem:[#allocation2 + $0xac] ss:$16 sps:$4 sm:$0xff]   ;;  %v3395_v10 = vld [vmem:[#allocation2 + $0xa0] ss:$16 sps:$4 sm:$0xff]  }
  0x50   :  { %v3396_v11 = vld [vmem:[#allocation2 + $0xa8] ss:$16 sps:$4 sm:$0xff]   ;;  %v3397_v12 = vld [vmem:[#allocation2 + $0x84] ss:$16 sps:$4 sm:$0xff]   ;;  %v3399_v13 = vld [vmem:[#allocation2 + $0x8c] ss:$16 sps:$4 sm:$0xff]  }
  0x51   :  { %v3401_v14 = vld [vmem:[#allocation2 + $0x80] ss:$16 sps:$4 sm:$0xff]   ;;  %v3402_v15 = vld [vmem:[#allocation2 + $0x88] ss:$16 sps:$4 sm:$0xff]   ;;  %v3403_v16 = vld [vmem:[#allocation2 + $0x64] ss:$16 sps:$4 sm:$0xff]  }
  0x52   :  { %550 = vmatpush1.bf16.msra.mxu0 %v3389_v6  ;;  %591 = vmatpush1.bf16.msra.mxu1 %v3390_v7  ;;  %v3405_v17 = vld [vmem:[#allocation2 + $0x6c] ss:$16 sps:$4 sm:$0xff]   ;;  %v3407_v18 = vld [vmem:[#allocation2 + $0x60] ss:$16 sps:$4 sm:$0xff]   ;;  %v3408_v19 = vld [vmem:[#allocation2 + $0x68] ss:$16 sps:$4 sm:$0xff]  }
  0x53   :  { %551 = vmatprep.subr.bf16.mxu0 %v3391_v8  ;;  %592 = vmatprep.subr.bf16.mxu1 %v3393_v9  ;;  %v3409_v20 = vld [vmem:[#allocation2 + $0x44] ss:$16 sps:$4 sm:$0xff]   ;;  %v3411_v21 = vld [vmem:[#allocation2 + $0x4c] ss:$16 sps:$4 sm:$0xff]   ;;  %v3413_v22 = vld [vmem:[#allocation2 + $0x40] ss:$16 sps:$4 sm:$0xff]  }
  0x54   :  { %v3414_v23 = vld [vmem:[#allocation2 + $0x48] ss:$16 sps:$4 sm:$0xff]   ;;  %v3415_v24 = vld [vmem:[#allocation2 + $0x24] ss:$16 sps:$4 sm:$0xff]   ;;  %v3417_v25 = vld [vmem:[#allocation2 + $0x2c] ss:$16 sps:$4 sm:$0xff]  }
  0x55   :  { %v3419_v26 = vld [vmem:[#allocation2 + $0x20] ss:$16 sps:$4 sm:$0xff]   ;;  %v3420_v27 = vld [vmem:[#allocation2 + $0x28] ss:$16 sps:$4 sm:$0xff]   ;;  %v3421_v28 = vld [vmem:[#allocation2 + $0x4] ss:$16 sps:$4 sm:$0xff]  }
  0x56   :  { %552 = vmatpush1.bf16.msra.mxu0 %v3395_v10  ;;  %593 = vmatpush1.bf16.msra.mxu1 %v3396_v11  ;;  %v3423_v29 = vld [vmem:[#allocation2 + $0xc] ss:$16 sps:$4 sm:$0xff]   ;;  %v3425_v30 = vld [vmem:[#allocation2] ss:$16 sps:$4 sm:$0xff]   ;;  %v3426_v31 = vld [vmem:[#allocation2 + $0x8] ss:$16 sps:$4 sm:$0xff]  }
  0x57   :  { %553 = vmatprep.subr.bf16.mxu0 %v3397_v12  ;;  %594 = vmatprep.subr.bf16.mxu1 %v3399_v13  ;;  %v3427_v32 = vld [vmem:[#allocation2 + $0x1e4] ss:$16 sps:$4 sm:$0xff]   ;;  %v3429_v33 = vld [vmem:[#allocation2 + $0x1ec] ss:$16 sps:$4 sm:$0xff]   ;;  %v3431_v34 = vld [vmem:[#allocation2 + $0x1e0] ss:$16 sps:$4 sm:$0xff]  }
  0x58   :  { %v3432_v35 = vld [vmem:[#allocation2 + $0x1e8] ss:$16 sps:$4 sm:$0xff]   ;;  %v3433_v36 = vld [vmem:[#allocation2 + $0x1c4] ss:$16 sps:$4 sm:$0xff]   ;;  %v3435_v37 = vld [vmem:[#allocation2 + $0x1cc] ss:$16 sps:$4 sm:$0xff]  }
  0x59   :  { %v3437_v38 = vld [vmem:[#allocation2 + $0x1c0] ss:$16 sps:$4 sm:$0xff]   ;;  %v3438_v39 = vld [vmem:[#allocation2 + $0x1c8] ss:$16 sps:$4 sm:$0xff]   ;;  %v3439_v40 = vld [vmem:[#allocation2 + $0x1a4] ss:$16 sps:$4 sm:$0xff]  }
  0x5a   :  { %554 = vmatpush1.bf16.msra.mxu0 %v3401_v14  ;;  %595 = vmatpush1.bf16.msra.mxu1 %v3402_v15  ;;  %v3441_v41 = vld [vmem:[#allocation2 + $0x1ac] ss:$16 sps:$4 sm:$0xff]   ;;  %v3443_v42 = vld [vmem:[#allocation2 + $0x1a0] ss:$16 sps:$4 sm:$0xff]   ;;  %v3444_v43 = vld [vmem:[#allocation2 + $0x1a8] ss:$16 sps:$4 sm:$0xff]  }
  0x5b   :  { %555 = vmatprep.subr.bf16.mxu0 %v3403_v16  ;;  %596 = vmatprep.subr.bf16.mxu1 %v3405_v17  ;;  %v3445_v44 = vld [vmem:[#allocation2 + $0x184] ss:$16 sps:$4 sm:$0xff]   ;;  %v3447_v45 = vld [vmem:[#allocation2 + $0x18c] ss:$16 sps:$4 sm:$0xff]   ;;  %s4297_s25 = sld [smem:[#allocation16_spill]] }
  0x5c   :  { %v3449_v47 = vld [vmem:[#allocation2 + $0x180] ss:$16 sps:$4 sm:$0xff]   ;;  %v3450_v49 = vld [vmem:[#allocation2 + $0x188] ss:$16 sps:$4 sm:$0xff]   ;;  %v3451_v50 = vld [vmem:[#allocation2 + $0x164] ss:$16 sps:$4 sm:$0xff]  }
  0x5d   :  { %v3453_v51 = vld [vmem:[#allocation2 + $0x16c] ss:$16 sps:$4 sm:$0xff]   ;;  %v3455_v52 = vld [vmem:[#allocation2 + $0x160] ss:$16 sps:$4 sm:$0xff]   ;;  %v3456_v53 = vld [vmem:[#allocation2 + $0x168] ss:$16 sps:$4 sm:$0xff]  }
  0x5e   :  { %556 = vmatpush1.bf16.msra.mxu0 %v3407_v18  ;;  %597 = vmatpush1.bf16.msra.mxu1 %v3408_v19  ;;  %v3457_v54 = vld [vmem:[#allocation2 + $0x144] ss:$16 sps:$4 sm:$0xff]   ;;  %v3459_v55 = vld [vmem:[#allocation2 + $0x14c] ss:$16 sps:$4 sm:$0xff]   ;;  %v3461_v56 = vld [vmem:[#allocation2 + $0x140] ss:$16 sps:$4 sm:$0xff]  }
  0x5f   :  { %557 = vmatprep.subr.bf16.mxu0 %v3409_v20  ;;  %598 = vmatprep.subr.bf16.mxu1 %v3411_v21  ;;  %v3462_v57 = vld [vmem:[#allocation2 + $0x148] ss:$16 sps:$4 sm:$0xff]   ;;  %v3463_v58 = vld [vmem:[#allocation2 + $0x124] ss:$16 sps:$4 sm:$0xff]   ;;  %v3465_v59 = vld [vmem:[#allocation2 + $0x12c] ss:$16 sps:$4 sm:$0xff]  }
  0x60   :  { %v3467_v60 = vld [vmem:[#allocation2 + $0x120] ss:$16 sps:$4 sm:$0xff]   ;;  %v3468_v61 = vld [vmem:[#allocation2 + $0x128] ss:$16 sps:$4 sm:$0xff]   ;;  %v3469_v62 = vld [vmem:[#allocation2 + $0x104] ss:$16 sps:$4 sm:$0xff]  }
  0x61   :  { %v133_v46 = vld [vmem:[%s4297_s25] sm:$0xff]  ;;  %v3471_v63 = vld [vmem:[#allocation2 + $0x10c] ss:$16 sps:$4 sm:$0xff]   ;;  %v3474_v1 = vld [vmem:[#allocation2 + $0x108] ss:$16 sps:$4 sm:$0xff]  }
  0x62   :  { %558 = vmatpush1.bf16.msra.mxu0 %v3413_v22  ;;  %599 = vmatpush1.bf16.msra.mxu1 %v3414_v23  ;;  %v2999_v48 = vcombine.high %v133_v46, %v133_v46  ;;  %v3473_v0 = vld [vmem:[#allocation2 + $0x100] ss:$16 sps:$4 sm:$0xff]   ;;  %v3479_v2 = vld [vmem:[#allocation4 + $0x74] ss:$8 sps:$4 sm:$0xff]   ;;  %v2998_v4 = vcombine.low %v133_v46, %v133_v46  ;;  %v3485_v7 = vld [vmem:[#allocation4 + $0x64] ss:$8 sps:$4 sm:$0xff]  }
  0x63   :  { %559 = vmatprep.subr.bf16.mxu0 %v3415_v24  ;;  %600 = vmatprep.subr.bf16.mxu1 %v3417_v25  ;;  %v3482_v3 = vld [vmem:[#allocation4 + $0x174] ss:$8 sps:$4 sm:$0xff]   ;;  %v3477_v5 = vld [vmem:[#allocation4 + $0x70] ss:$8 sps:$4 sm:$0xff]   ;;  %v3488_v8 = vld [vmem:[#allocation4 + $0x164] ss:$8 sps:$4 sm:$0xff]  }
  0x64   :  { %579 = vmatprep.mubr.bf16.mxu0 %v2999_v48  ;;  %620 = vmatprep.mubr.bf16.mxu1 %v2999_v48  ;;  %v3480_v6 = vld [vmem:[#allocation4 + $0x170] ss:$8 sps:$4 sm:$0xff]   ;;  %v3483_v9 = vld [vmem:[#allocation4 + $0x60] ss:$8 sps:$4 sm:$0xff]   ;;  %v3491_v11 = vld [vmem:[#allocation4 + $0x54] ss:$8 sps:$4 sm:$0xff]  }
  0x65   :  { %v3486_v10 = vld [vmem:[#allocation4 + $0x160] ss:$8 sps:$4 sm:$0xff]   ;;  %v3494_v12 = vld [vmem:[#allocation4 + $0x154] ss:$8 sps:$4 sm:$0xff]   ;;  %v3489_v13 = vld [vmem:[#allocation4 + $0x50] ss:$8 sps:$4 sm:$0xff]  }
  0x66   :  { %560 = vmatpush1.bf16.msra.mxu0 %v3419_v26  ;;  %601 = vmatpush1.bf16.msra.mxu1 %v3420_v27  ;;  %v3492_v14 = vld [vmem:[#allocation4 + $0x150] ss:$8 sps:$4 sm:$0xff]   ;;  %v3497_v15 = vld [vmem:[#allocation4 + $0x44] ss:$8 sps:$4 sm:$0xff]   ;;  %v3495_v17 = vld [vmem:[#allocation4 + $0x40] ss:$8 sps:$4 sm:$0xff]  }
  0x67   :  { %561 = vmatprep.subr.bf16.mxu0 %v3421_v28  ;;  %602 = vmatprep.subr.bf16.mxu1 %v3423_v29  ;;  %v3500_v16 = vld [vmem:[#allocation4 + $0x144] ss:$8 sps:$4 sm:$0xff]   ;;  %v3498_v18 = vld [vmem:[#allocation4 + $0x140] ss:$8 sps:$4 sm:$0xff]   ;;  %v3503_v19 = vld [vmem:[#allocation4 + $0x34] ss:$8 sps:$4 sm:$0xff]  }
  0x68   :  { %v3506_v20 = vld [vmem:[#allocation4 + $0x134] ss:$8 sps:$4 sm:$0xff]   ;;  %v3501_v21 = vld [vmem:[#allocation4 + $0x30] ss:$8 sps:$4 sm:$0xff]   ;;  %v3509_v23 = vld [vmem:[#allocation4 + $0x24] ss:$8 sps:$4 sm:$0xff]  }
  0x69   :  { %v3504_v22 = vld [vmem:[#allocation4 + $0x130] ss:$8 sps:$4 sm:$0xff]   ;;  %v3512_v24 = vld [vmem:[#allocation4 + $0x124] ss:$8 sps:$4 sm:$0xff]   ;;  %v3507_v25 = vld [vmem:[#allocation4 + $0x20] ss:$8 sps:$4 sm:$0xff]  }
  0x6a   :  { %562 = vmatpush1.bf16.msra.mxu0 %v3425_v30  ;;  %603 = vmatpush1.bf16.msra.mxu1 %v3426_v31  ;;  %v3510_v26 = vld [vmem:[#allocation4 + $0x120] ss:$8 sps:$4 sm:$0xff]   ;;  %v3515_v27 = vld [vmem:[#allocation4 + $0x14] ss:$8 sps:$4 sm:$0xff]   ;;  %v3513_v29 = vld [vmem:[#allocation4 + $0x10] ss:$8 sps:$4 sm:$0xff]  }
  0x6b   :  { %563 = vmatprep.subr.bf16.mxu0 %v3427_v32  ;;  %604 = vmatprep.subr.bf16.mxu1 %v3429_v33  ;;  %v3518_v28 = vld [vmem:[#allocation4 + $0x114] ss:$8 sps:$4 sm:$0xff]   ;;  %v3516_v30 = vld [vmem:[#allocation4 + $0x110] ss:$8 sps:$4 sm:$0xff]   ;;  %v3521_v31 = vld [vmem:[#allocation4 + $0x4] ss:$8 sps:$4 sm:$0xff]  }
  0x6c   :  { %v3524_v32 = vld [vmem:[#allocation4 + $0x104] ss:$8 sps:$4 sm:$0xff]   ;;  %v3519_v33 = vld [vmem:[#allocation4] ss:$8 sps:$4 sm:$0xff]   ;;  %v3540_v46 = vld [vmem:[#allocation4 + $0x1d0] ss:$8 sps:$4 sm:$0xff]  }
  0x6d   :  { %v3548_v48 = vld [vmem:[#allocation4 + $0x1c4] ss:$8 sps:$4 sm:$0xff]  }
  0x6e   :  { %564 = vmatpush2.bf16.msra.mxu0 %v3431_v34  ;;  %605 = vmatpush2.bf16.msra.mxu1 %v3432_v35  ;;  %v3522_v34 = vld [vmem:[#allocation4 + $0x100] ss:$8 sps:$4 sm:$0xff]   ;;  %v3527_v35 = vld [vmem:[#allocation4 + $0xf4] ss:$8 sps:$4 sm:$0xff]  }
  0x6f   :  { %565 = vmatprep.subr.bf16.mxu0 %v3433_v36  ;;  %606 = vmatprep.subr.bf16.mxu1 %v3435_v37  ;;  %v3530_v36 = vld [vmem:[#allocation4 + $0x1f4] ss:$8 sps:$4 sm:$0xff]   ;;  %v3525_v37 = vld [vmem:[#allocation4 + $0xf0] ss:$8 sps:$4 sm:$0xff]  }
  0x72   :  { %566 = vmatpush2.bf16.msra.mxu0 %v3437_v38  ;;  %607 = vmatpush2.bf16.msra.mxu1 %v3438_v39  ;;  %v3528_v38 = vld [vmem:[#allocation4 + $0x1f0] ss:$8 sps:$4 sm:$0xff]   ;;  %v3533_v39 = vld [vmem:[#allocation4 + $0xe4] ss:$8 sps:$4 sm:$0xff]  }
  0x73   :  { %567 = vmatprep.subr.bf16.mxu0 %v3439_v40  ;;  %608 = vmatprep.subr.bf16.mxu1 %v3441_v41  ;;  %v3536_v40 = vld [vmem:[#allocation4 + $0x1e4] ss:$8 sps:$4 sm:$0xff]   ;;  %v3531_v41 = vld [vmem:[#allocation4 + $0xe0] ss:$8 sps:$4 sm:$0xff]  }
  0x76   :  { %568 = vmatpush2.bf16.msra.mxu0 %v3443_v42  ;;  %609 = vmatpush2.bf16.msra.mxu1 %v3444_v43  ;;  %v3534_v42 = vld [vmem:[#allocation4 + $0x1e0] ss:$8 sps:$4 sm:$0xff]   ;;  %v3539_v43 = vld [vmem:[#allocation4 + $0xd4] ss:$8 sps:$4 sm:$0xff]  }
  0x77   :  { %569 = vmatprep.subr.bf16.mxu0 %v3445_v44  ;;  %610 = vmatprep.subr.bf16.mxu1 %v3447_v45  ;;  %v3542_v44 = vld [vmem:[#allocation4 + $0x1d4] ss:$8 sps:$4 sm:$0xff]   ;;  %v3537_v45 = vld [vmem:[#allocation4 + $0xd0] ss:$8 sps:$4 sm:$0xff]  }
  0x7a   :  { %570 = vmatpush2.bf16.msra.mxu0 %v3449_v47  ;;  %611 = vmatpush2.bf16.msra.mxu1 %v3450_v49  ;;  %v3545_v47 = vld [vmem:[#allocation4 + $0xc4] ss:$8 sps:$4 sm:$0xff]   ;;  %v3543_v49 = vld [vmem:[#allocation4 + $0xc0] ss:$8 sps:$4 sm:$0xff]  }
  0x7b   :  { %571 = vmatprep.subr.bf16.mxu0 %v3451_v50  ;;  %612 = vmatprep.subr.bf16.mxu1 %v3453_v51  ;;  %v3546_v50 = vld [vmem:[#allocation4 + $0x1c0] ss:$8 sps:$4 sm:$0xff]   ;;  %v3551_v51 = vld [vmem:[#allocation4 + $0xb4] ss:$8 sps:$4 sm:$0xff]  }
  0x7e   :  { %572 = vmatpush2.bf16.msra.mxu0 %v3455_v52  ;;  %613 = vmatpush2.bf16.msra.mxu1 %v3456_v53  ;;  %v3554_v52 = vld [vmem:[#allocation4 + $0x1b4] ss:$8 sps:$4 sm:$0xff]   ;;  %v3549_v53 = vld [vmem:[#allocation4 + $0xb0] ss:$8 sps:$4 sm:$0xff]  }
  0x7f   :  { %573 = vmatprep.subr.bf16.mxu0 %v3457_v54  ;;  %614 = vmatprep.subr.bf16.mxu1 %v3459_v55  ;;  %v3552_v54 = vld [vmem:[#allocation4 + $0x1b0] ss:$8 sps:$4 sm:$0xff]   ;;  %v3557_v55 = vld [vmem:[#allocation4 + $0xa4] ss:$8 sps:$4 sm:$0xff]  }
  0x82   :  { %574 = vmatpush2.bf16.msra.mxu0 %v3461_v56  ;;  %615 = vmatpush2.bf16.msra.mxu1 %v3462_v57  ;;  %v3560_v56 = vld [vmem:[#allocation4 + $0x1a4] ss:$8 sps:$4 sm:$0xff]   ;;  %v3555_v57 = vld [vmem:[#allocation4 + $0xa0] ss:$8 sps:$4 sm:$0xff]  }
  0x83   :  { %575 = vmatprep.subr.bf16.mxu0 %v3463_v58  ;;  %616 = vmatprep.subr.bf16.mxu1 %v3465_v59  ;;  %v3558_v58 = vld [vmem:[#allocation4 + $0x1a0] ss:$8 sps:$4 sm:$0xff]   ;;  %v3563_v59 = vld [vmem:[#allocation4 + $0x94] ss:$8 sps:$4 sm:$0xff]  }
  0x86   :  { %576 = vmatpush2.bf16.msra.mxu0 %v3467_v60  ;;  %617 = vmatpush2.bf16.msra.mxu1 %v3468_v61  ;;  %v3566_v60 = vld [vmem:[#allocation4 + $0x194] ss:$8 sps:$4 sm:$0xff]   ;;  %v3561_v61 = vld [vmem:[#allocation4 + $0x90] ss:$8 sps:$4 sm:$0xff]  }
  0x87   :  { %577 = vmatprep.subr.bf16.mxu0 %v3469_v62  ;;  %618 = vmatprep.subr.bf16.mxu1 %v3471_v63  ;;  %v3564_v62 = vld [vmem:[#allocation4 + $0x190] ss:$8 sps:$4 sm:$0xff]   ;;  %v3569_v63 = vld [vmem:[#allocation4 + $0x84] ss:$8 sps:$4 sm:$0xff]  }
  0x8a   :  { %578 = vmatpush2.bf16.msra.mxu0 %v3473_v0  ;;  %619 = vmatpush2.bf16.msra.mxu1 %v3474_v1  ;;  %v3572_v0 = vld [vmem:[#allocation4 + $0x184] ss:$8 sps:$4 sm:$0xff]   ;;  %v3567_v1 = vld [vmem:[#allocation4 + $0x80] ss:$8 sps:$4 sm:$0xff]  }
  0x8b   :  { %1033 = vmatprep.subr.bf16.mxu0 %v3479_v2  ;;  %1074 = vmatprep.subr.bf16.mxu1 %v3482_v3  ;;  %v3570_v2 = vld [vmem:[#allocation4 + $0x180] ss:$8 sps:$4 sm:$0xff]   ;;  %v3575_v3 = vld [vmem:[#allocation6 + $0x74] ss:$8 sps:$4 sm:$0xff]  }
  0x8d   :  { %580 = vmatmul.mubr.bf16.vlgmr.msra.gmra.mxu0 %v2998_v4  ;;  %621 = vmatmul.mubr.bf16.vlgmr.msra.gmra.mxu1 %v2998_v4  ;;  %v200_v4 = vlaneseq }
  0x8e   :  { %1034 = vmatpush1.bf16.msra.mxu0 %v3477_v5  ;;  %1075 = vmatpush1.bf16.msra.mxu1 %v3480_v6 }
  0x8f   :  { %1035 = vmatprep.subr.bf16.mxu0 %v3485_v7  ;;  %1076 = vmatprep.subr.bf16.mxu1 %v3488_v8  ;;  %v201_v5 = vshrl.u32 %v200_v4, 7  ;;  %v198_v8 = vld [vmem:[%s4282_s3] sm:$0xf] }
  0x90   :  { %v701_v4 = vld [vmem:[%s4284_s5] sm:$0x3] }
  0x91   :  { %v4206_v6 = vsub.s32 0, %v201_v5  ;;  %v4208_v7 = vsub.s32 2, %v201_v5 }
  0x92   :  { %1036 = vmatpush1.bf16.msra.mxu0 %v3483_v9  ;;  %1077 = vmatpush1.bf16.msra.mxu1 %v3486_v10  ;;  %v4213_v9 = vsub.s32 1, %v201_v5  ;;  %v4215_v10 = vsub.s32 3, %v201_v5 }
  0x93   :  { %1037 = vmatprep.subr.bf16.mxu0 %v3491_v11  ;;  %1078 = vmatprep.subr.bf16.mxu1 %v3494_v12  ;;  %v203_v11 = vrot.slane %v198_v8, %v4206_v6  ;;  %v211_v12 = vrot.slane %v198_v8, %v4208_v7  ;;  %v706_v5 = vrot.slane %v701_v4, %v4206_v6 }
  0x96   :  { %1038 = vmatpush1.bf16.msra.mxu0 %v3489_v13  ;;  %1079 = vmatpush1.bf16.msra.mxu1 %v3492_v14  ;;  %v207_v13 = vrot.slane %v198_v8, %v4213_v9  ;;  %v215_v14 = vrot.slane %v198_v8, %v4215_v10  ;;  %v710_v8 = vrot.slane %v701_v4, %v4213_v9  ;;  %v3720_v4 = vld [vmem:[#allocation9 + $0x168] ss:$16 sps:$4 sm:$0xff]  }
  0x97   :  { %1039 = vmatprep.subr.bf16.mxu0 %v3497_v15  ;;  %1080 = vmatprep.subr.bf16.mxu1 %v3500_v16 }
  0x9a   :  { %1040 = vmatpush1.bf16.msra.mxu0 %v3495_v17  ;;  %1081 = vmatpush1.bf16.msra.mxu1 %v3498_v18 }
  0x9b   :  { %1041 = vmatprep.subr.bf16.mxu0 %v3503_v19  ;;  %1082 = vmatprep.subr.bf16.mxu1 %v3506_v20 }
  0x9e   :  { %1042 = vmatpush1.bf16.msra.mxu0 %v3501_v21  ;;  %1083 = vmatpush1.bf16.msra.mxu1 %v3504_v22 }
  0x9f   :  { %1043 = vmatprep.subr.bf16.mxu0 %v3509_v23  ;;  %1084 = vmatprep.subr.bf16.mxu1 %v3512_v24 }
  0xa2   :  { %1044 = vmatpush1.bf16.msra.mxu0 %v3507_v25  ;;  %1085 = vmatpush1.bf16.msra.mxu1 %v3510_v26 }
  0xa3   :  { %1045 = vmatprep.subr.bf16.mxu0 %v3515_v27  ;;  %1086 = vmatprep.subr.bf16.mxu1 %v3518_v28 }
  0xa6   :  { %1046 = vmatpush1.bf16.msra.mxu0 %v3513_v29  ;;  %1087 = vmatpush1.bf16.msra.mxu1 %v3516_v30 }
  0xa7   :  { %1047 = vmatprep.subr.bf16.mxu0 %v3521_v31  ;;  %1088 = vmatprep.subr.bf16.mxu1 %v3524_v32 }
  0xaa   :  { %1048 = vmatpush1.bf16.msra.mxu0 %v3519_v33  ;;  %1089 = vmatpush1.bf16.msra.mxu1 %v3522_v34  ;;  %v3573_v34 = vld [vmem:[#allocation6 + $0x70] ss:$8 sps:$4 sm:$0xff]  }
  0xab   :  { %1049 = vmatprep.subr.bf16.mxu0 %v3527_v35  ;;  %1090 = vmatprep.subr.bf16.mxu1 %v3530_v36  ;;  %v3578_v36 = vld [vmem:[#allocation6 + $0x64] ss:$8 sps:$4 sm:$0xff]  }
  0xae   :  { %1050 = vmatpush2.bf16.msra.mxu0 %v3525_v37  ;;  %1091 = vmatpush2.bf16.msra.mxu1 %v3528_v38  ;;  %v3576_v37 = vld [vmem:[#allocation6 + $0x60] ss:$8 sps:$4 sm:$0xff]   ;;  %v3581_v38 = vld [vmem:[#allocation6 + $0x54] ss:$8 sps:$4 sm:$0xff]  }
  0xaf   :  { %1051 = vmatprep.subr.bf16.mxu0 %v3533_v39  ;;  %1092 = vmatprep.subr.bf16.mxu1 %v3536_v40  ;;  %v3579_v39 = vld [vmem:[#allocation6 + $0x50] ss:$8 sps:$4 sm:$0xff]   ;;  %v3584_v40 = vld [vmem:[#allocation6 + $0x44] ss:$8 sps:$4 sm:$0xff]  }
  0xb2   :  { %1052 = vmatpush2.bf16.msra.mxu0 %v3531_v41  ;;  %1093 = vmatpush2.bf16.msra.mxu1 %v3534_v42  ;;  %v3582_v41 = vld [vmem:[#allocation6 + $0x40] ss:$8 sps:$4 sm:$0xff]   ;;  %v3587_v42 = vld [vmem:[#allocation6 + $0x34] ss:$8 sps:$4 sm:$0xff]  }
  0xb3   :  { %1053 = vmatprep.subr.bf16.mxu0 %v3539_v43  ;;  %1094 = vmatprep.subr.bf16.mxu1 %v3542_v44  ;;  %v3585_v43 = vld [vmem:[#allocation6 + $0x30] ss:$8 sps:$4 sm:$0xff]   ;;  %v3590_v44 = vld [vmem:[#allocation6 + $0x24] ss:$8 sps:$4 sm:$0xff]  }
  0xb6   :  { %1054 = vmatpush2.bf16.msra.mxu0 %v3537_v45  ;;  %1095 = vmatpush2.bf16.msra.mxu1 %v3540_v46  ;;  %v3588_v45 = vld [vmem:[#allocation6 + $0x20] ss:$8 sps:$4 sm:$0xff]   ;;  %v3593_v46 = vld [vmem:[#allocation6 + $0x14] ss:$8 sps:$4 sm:$0xff]  }
  0xb7   :  { %1055 = vmatprep.subr.bf16.mxu0 %v3545_v47  ;;  %1096 = vmatprep.subr.bf16.mxu1 %v3548_v48  ;;  %v3591_v47 = vld [vmem:[#allocation6 + $0x10] ss:$8 sps:$4 sm:$0xff]   ;;  %v3596_v48 = vld [vmem:[#allocation6 + $0x4] ss:$8 sps:$4 sm:$0xff]  }
  0xba   :  { %1056 = vmatpush2.bf16.msra.mxu0 %v3543_v49  ;;  %1097 = vmatpush2.bf16.msra.mxu1 %v3546_v50  ;;  %v3594_v49 = vld [vmem:[#allocation6] ss:$8 sps:$4 sm:$0xff]   ;;  %v3599_v50 = vld [vmem:[#allocation6 + $0xf4] ss:$8 sps:$4 sm:$0xff]  }
  0xbb   :  { %1057 = vmatprep.subr.bf16.mxu0 %v3551_v51  ;;  %1098 = vmatprep.subr.bf16.mxu1 %v3554_v52  ;;  %v3597_v51 = vld [vmem:[#allocation6 + $0xf0] ss:$8 sps:$4 sm:$0xff]   ;;  %v3602_v52 = vld [vmem:[#allocation6 + $0xe4] ss:$8 sps:$4 sm:$0xff]  }
  0xbe   :  { %1058 = vmatpush2.bf16.msra.mxu0 %v3549_v53  ;;  %1099 = vmatpush2.bf16.msra.mxu1 %v3552_v54  ;;  %v3600_v53 = vld [vmem:[#allocation6 + $0xe0] ss:$8 sps:$4 sm:$0xff]   ;;  %v3605_v54 = vld [vmem:[#allocation6 + $0xd4] ss:$8 sps:$4 sm:$0xff]  }
  0xbf   :  { %1059 = vmatprep.subr.bf16.mxu0 %v3557_v55  ;;  %1100 = vmatprep.subr.bf16.mxu1 %v3560_v56  ;;  %v3603_v55 = vld [vmem:[#allocation6 + $0xd0] ss:$8 sps:$4 sm:$0xff]   ;;  %v3608_v56 = vld [vmem:[#allocation6 + $0xc4] ss:$8 sps:$4 sm:$0xff]  }
  0xc2   :  { %1060 = vmatpush2.bf16.msra.mxu0 %v3555_v57  ;;  %1101 = vmatpush2.bf16.msra.mxu1 %v3558_v58  ;;  %v3606_v57 = vld [vmem:[#allocation6 + $0xc0] ss:$8 sps:$4 sm:$0xff]   ;;  %v3611_v58 = vld [vmem:[#allocation6 + $0xb4] ss:$8 sps:$4 sm:$0xff]  }
  0xc3   :  { %1061 = vmatprep.subr.bf16.mxu0 %v3563_v59  ;;  %1102 = vmatprep.subr.bf16.mxu1 %v3566_v60  ;;  %v3609_v59 = vld [vmem:[#allocation6 + $0xb0] ss:$8 sps:$4 sm:$0xff]   ;;  %v3614_v60 = vld [vmem:[#allocation6 + $0xa4] ss:$8 sps:$4 sm:$0xff]  }
  0xc6   :  { %1062 = vmatpush2.bf16.msra.mxu0 %v3561_v61  ;;  %1103 = vmatpush2.bf16.msra.mxu1 %v3564_v62  ;;  %v3612_v61 = vld [vmem:[#allocation6 + $0xa0] ss:$8 sps:$4 sm:$0xff]   ;;  %v3617_v62 = vld [vmem:[#allocation6 + $0x94] ss:$8 sps:$4 sm:$0xff]  }
  0xc7   :  { %1063 = vmatprep.subr.bf16.mxu0 %v3569_v63  ;;  %1104 = vmatprep.subr.bf16.mxu1 %v3572_v0  ;;  %v3615_v63 = vld [vmem:[#allocation6 + $0x90] ss:$8 sps:$4 sm:$0xff]   ;;  %v3620_v0 = vld [vmem:[#allocation6 + $0x84] ss:$8 sps:$4 sm:$0xff]  }
  0xca   :  { %1064 = vmatpush2.bf16.msra.mxu0 %v3567_v1  ;;  %1105 = vmatpush2.bf16.msra.mxu1 %v3570_v2  ;;  %v3618_v1 = vld [vmem:[#allocation6 + $0x80] ss:$8 sps:$4 sm:$0xff]   ;;  %v3621_v2 = vld [vmem:[#allocation7 + $0x70] ss:$8 sps:$4 sm:$0xff]  }
  0xcb   :  { %1323 = vmatprep.subr.bf16.mxu0 %v3575_v3  ;;  %v3623_v3 = vld [vmem:[#allocation7 + $0x74] ss:$8 sps:$4 sm:$0xff]  }
  0xcc   :  { %1481 = vmatprep.subr.bf16.mxu1 %v3623_v3  ;;  %v3722_v3 = vld [vmem:[#allocation9 + $0x16c] ss:$16 sps:$4 sm:$0xff]  }
 0x14d   :  { %v581_v15 = vpop.f32.mrf.mxu0  ;;  %v622_v16 = vpop.f32.mrf.mxu1 }
 0x14e   :  { %v582_v17 = vadd.f32 %v581_v15, %v203_v11  ;;  %v623_v18 = vadd.f32 %v622_v16, %v211_v12 }
 0x14f   :  { %v583_v19 = vpop.f32.mrf.mxu0  ;;  %v624_v20 = vpop.f32.mrf.mxu1 }
 0x150   :  { %v631_v21 = vmax.f32 %v623_v18, 0.0  ;;  %v584_v22 = vadd.f32 %v583_v19, %v207_v13  ;;  %v625_v23 = vadd.f32 %v624_v20, %v215_v14  ;;  %v629_v24 = vmax.f32 %v582_v17, 0.0 }
 0x151   :  { %v585_v25 = vpop.f32.mrf.mxu0  ;;  %v626_v26 = vpop.f32.mrf.mxu1 }
 0x152   :  { %v630_v27 = vmax.f32 %v584_v22, 0.0  ;;  %v632_v28 = vmax.f32 %v625_v23, 0.0  ;;  %v635_v29 = vpack.c.bf16 %v631_v21, %v631_v21  ;;  %v633_v35 = vpack.c.bf16 %v629_v24, %v629_v24 }
 0x153   :  { %v586_v30 = vpop.f32.mrf.mxu0  ;;  %v627_v31 = vpop.f32.mrf.mxu1 }
 0x154   :  { %v634_v32 = vpack.c.bf16 %v630_v27, %v630_v27  ;;  %v636_v33 = vpack.c.bf16 %v632_v28, %v632_v28  ;;  %v3626_v27 = vld [vmem:[#allocation7 + $0x64] ss:$8 sps:$4 sm:$0xff]   ;;  %v3624_v28 = vld [vmem:[#allocation7 + $0x60] ss:$8 sps:$4 sm:$0xff]   ;;  %v3627_v30 = vld [vmem:[#allocation7 + $0x50] ss:$8 sps:$4 sm:$0xff]  }
 0x155   :  { %v3632_v31 = vld [vmem:[#allocation7 + $0x44] ss:$8 sps:$4 sm:$0xff]  }
 0x156   :  { %1065 = vmatprep.mubr.bf16.mxu0 %v634_v32  ;;  %1106 = vmatprep.mubr.bf16.mxu1 %v636_v33  ;;  %v3630_v32 = vld [vmem:[#allocation7 + $0x40] ss:$8 sps:$4 sm:$0xff]   ;;  %v3635_v33 = vld [vmem:[#allocation7 + $0x34] ss:$8 sps:$4 sm:$0xff]  }
 0x157   :  { %1066 = vmatmul.mubr.bf16.vlgmr.msra.gmra.mxu0 %v633_v35  ;;  %1107 = vmatmul.mubr.bf16.vlgmr.msra.gmra.mxu1 %v635_v29  ;;  %v3629_v29 = vld [vmem:[#allocation7 + $0x54] ss:$8 sps:$4 sm:$0xff]   ;;  %v3638_v35 = vld [vmem:[#allocation7 + $0x24] ss:$8 sps:$4 sm:$0xff]  }
 0x158   :  { %1324 = vmatpush1.bf16.msra.mxu0 %v3573_v34  ;;  %1482 = vmatpush1.bf16.msra.mxu1 %v3621_v2  ;;  %v3633_v34 = vld [vmem:[#allocation7 + $0x30] ss:$8 sps:$4 sm:$0xff]  }
 0x159   :  { %1325 = vmatprep.subr.bf16.mxu0 %v3578_v36  ;;  %1483 = vmatprep.subr.bf16.mxu1 %v3626_v27  ;;  %v4081_v36 = vmov 0   ;;  %v3714_v2 = vld [vmem:[#allocation9 + $0x188] ss:$16 sps:$4 sm:$0xff]  }
 0x15a   :  { %1513 = vmatprep.mubr.bf16.mxu1 %v4081_v36  ;;  %v3677_v36 = vld [vmem:[#allocation9 + $0x44] ss:$16 sps:$4 sm:$0xff]  }
 0x15c   :  { %1326 = vmatpush1.bf16.msra.mxu0 %v3576_v37  ;;  %1484 = vmatpush1.bf16.msra.mxu1 %v3624_v28  ;;  %v3636_v37 = vld [vmem:[#allocation7 + $0x20] ss:$8 sps:$4 sm:$0xff]   ;;  %v3653_v28 = vld [vmem:[#allocation9 + $0xc4] ss:$16 sps:$4 sm:$0xff]  }
 0x15d   :  { %1327 = vmatprep.subr.bf16.mxu0 %v3581_v38  ;;  %1485 = vmatprep.subr.bf16.mxu1 %v3629_v29  ;;  %v3641_v38 = vld [vmem:[#allocation7 + $0x14] ss:$8 sps:$4 sm:$0xff]   ;;  %v3651_v29 = vld [vmem:[#allocation9 + $0xc0] ss:$16 sps:$4 sm:$0xff]  }
 0x160   :  { %1328 = vmatpush1.bf16.msra.mxu0 %v3579_v39  ;;  %1486 = vmatpush1.bf16.msra.mxu1 %v3627_v30  ;;  %v3639_v39 = vld [vmem:[#allocation7 + $0x10] ss:$8 sps:$4 sm:$0xff]   ;;  %v3659_v30 = vld [vmem:[#allocation9 + $0xa4] ss:$16 sps:$4 sm:$0xff]  }
 0x161   :  { %1329 = vmatprep.subr.bf16.mxu0 %v3584_v40  ;;  %1487 = vmatprep.subr.bf16.mxu1 %v3632_v31  ;;  %v3644_v40 = vld [vmem:[#allocation7 + $0x4] ss:$8 sps:$4 sm:$0xff]   ;;  %v3657_v31 = vld [vmem:[#allocation9 + $0xa0] ss:$16 sps:$4 sm:$0xff]  }
 0x164   :  { %1330 = vmatpush1.bf16.msra.mxu0 %v3582_v41  ;;  %1488 = vmatpush1.bf16.msra.mxu1 %v3630_v32  ;;  %v3642_v41 = vld [vmem:[#allocation7] ss:$8 sps:$4 sm:$0xff]   ;;  %v3665_v32 = vld [vmem:[#allocation9 + $0x84] ss:$16 sps:$4 sm:$0xff]  }
 0x165   :  { %1331 = vmatprep.subr.bf16.mxu0 %v3587_v42  ;;  %1489 = vmatprep.subr.bf16.mxu1 %v3635_v33  ;;  %v3647_v42 = vld [vmem:[#allocation9 + $0xe4] ss:$16 sps:$4 sm:$0xff]   ;;  %v3663_v33 = vld [vmem:[#allocation9 + $0x80] ss:$16 sps:$4 sm:$0xff]  }
 0x168   :  { %1332 = vmatpush1.bf16.msra.mxu0 %v3585_v43  ;;  %1490 = vmatpush1.bf16.msra.mxu1 %v3633_v34  ;;  %v3648_v43 = vld [vmem:[#allocation9 + $0xe8] ss:$16 sps:$4 sm:$0xff]   ;;  %v3671_v34 = vld [vmem:[#allocation9 + $0x64] ss:$16 sps:$4 sm:$0xff]  }
 0x169   :  { %1333 = vmatprep.subr.bf16.mxu0 %v3590_v44  ;;  %1491 = vmatprep.subr.bf16.mxu1 %v3638_v35  ;;  %v3650_v44 = vld [vmem:[#allocation9 + $0xec] ss:$16 sps:$4 sm:$0xff]   ;;  %v3669_v35 = vld [vmem:[#allocation9 + $0x60] ss:$16 sps:$4 sm:$0xff]  }
 0x16c   :  { %1334 = vmatpush1.bf16.msra.mxu0 %v3588_v45  ;;  %1492 = vmatpush1.bf16.msra.mxu1 %v3636_v37  ;;  %v3656_v45 = vld [vmem:[#allocation9 + $0xcc] ss:$16 sps:$4 sm:$0xff]   ;;  %v3675_v37 = vld [vmem:[#allocation9 + $0x40] ss:$16 sps:$4 sm:$0xff]  }
 0x16d   :  { %1335 = vmatprep.subr.bf16.mxu0 %v3593_v46  ;;  %1493 = vmatprep.subr.bf16.mxu1 %v3641_v38  ;;  %v3654_v46 = vld [vmem:[#allocation9 + $0xc8] ss:$16 sps:$4 sm:$0xff]   ;;  %v3683_v38 = vld [vmem:[#allocation9 + $0x24] ss:$16 sps:$4 sm:$0xff]  }
 0x170   :  { %1336 = vmatpush1.bf16.msra.mxu0 %v3591_v47  ;;  %1494 = vmatpush1.bf16.msra.mxu1 %v3639_v39  ;;  %v3662_v47 = vld [vmem:[#allocation9 + $0xac] ss:$16 sps:$4 sm:$0xff]   ;;  %v3681_v39 = vld [vmem:[#allocation9 + $0x20] ss:$16 sps:$4 sm:$0xff]  }
 0x171   :  { %1337 = vmatprep.subr.bf16.mxu0 %v3596_v48  ;;  %1495 = vmatprep.subr.bf16.mxu1 %v3644_v40  ;;  %v3660_v48 = vld [vmem:[#allocation9 + $0xa8] ss:$16 sps:$4 sm:$0xff]   ;;  %v3689_v40 = vld [vmem:[#allocation9 + $0x4] ss:$16 sps:$4 sm:$0xff]  }
 0x174   :  { %1338 = vmatpush1.bf16.msra.mxu0 %v3594_v49  ;;  %1496 = vmatpush1.bf16.msra.mxu1 %v3642_v41  ;;  %v3668_v49 = vld [vmem:[#allocation9 + $0x8c] ss:$16 sps:$4 sm:$0xff]   ;;  %v3687_v41 = vld [vmem:[#allocation9] ss:$16 sps:$4 sm:$0xff]  }
 0x175   :  { %1339 = vmatprep.subr.bf16.mxu0 %v3599_v50  ;;  %1930 = vmatprep.subr.bf16.mxu1 %v3647_v42  ;;  %v3666_v50 = vld [vmem:[#allocation9 + $0x88] ss:$16 sps:$4 sm:$0xff]   ;;  %v3695_v42 = vld [vmem:[#allocation9 + $0x1e4] ss:$16 sps:$4 sm:$0xff]  }
 0x178   :  { %1340 = vmatpush2.bf16.msra.mxu0 %v3597_v51  ;;  %v3674_v51 = vld [vmem:[#allocation9 + $0x6c] ss:$16 sps:$4 sm:$0xff]  }
 0x179   :  { %1341 = vmatprep.subr.bf16.mxu0 %v3602_v52  ;;  %v3672_v52 = vld [vmem:[#allocation9 + $0x68] ss:$16 sps:$4 sm:$0xff]  }
 0x17c   :  { %1342 = vmatpush2.bf16.msra.mxu0 %v3600_v53  ;;  %v3680_v53 = vld [vmem:[#allocation9 + $0x4c] ss:$16 sps:$4 sm:$0xff]  }
 0x17d   :  { %1343 = vmatprep.subr.bf16.mxu0 %v3605_v54  ;;  %v3678_v54 = vld [vmem:[#allocation9 + $0x48] ss:$16 sps:$4 sm:$0xff]  }
 0x180   :  { %1344 = vmatpush2.bf16.msra.mxu0 %v3603_v55  ;;  %v3686_v55 = vld [vmem:[#allocation9 + $0x2c] ss:$16 sps:$4 sm:$0xff]  }
 0x181   :  { %1345 = vmatprep.subr.bf16.mxu0 %v3608_v56  ;;  %v3684_v56 = vld [vmem:[#allocation9 + $0x28] ss:$16 sps:$4 sm:$0xff]  }
 0x184   :  { %1346 = vmatpush2.bf16.msra.mxu0 %v3606_v57  ;;  %v3692_v57 = vld [vmem:[#allocation9 + $0xc] ss:$16 sps:$4 sm:$0xff]  }
 0x185   :  { %1347 = vmatprep.subr.bf16.mxu0 %v3611_v58  ;;  %v3690_v58 = vld [vmem:[#allocation9 + $0x8] ss:$16 sps:$4 sm:$0xff]  }
 0x188   :  { %1348 = vmatpush2.bf16.msra.mxu0 %v3609_v59  ;;  %v3698_v59 = vld [vmem:[#allocation9 + $0x1ec] ss:$16 sps:$4 sm:$0xff]  }
 0x189   :  { %1349 = vmatprep.subr.bf16.mxu0 %v3614_v60  ;;  %v3696_v60 = vld [vmem:[#allocation9 + $0x1e8] ss:$16 sps:$4 sm:$0xff]  }
 0x18c   :  { %1350 = vmatpush2.bf16.msra.mxu0 %v3612_v61  ;;  %v3704_v61 = vld [vmem:[#allocation9 + $0x1cc] ss:$16 sps:$4 sm:$0xff]  }
 0x18d   :  { %1351 = vmatprep.subr.bf16.mxu0 %v3617_v62  ;;  %v3702_v62 = vld [vmem:[#allocation9 + $0x1c8] ss:$16 sps:$4 sm:$0xff]  }
 0x190   :  { %1352 = vmatpush2.bf16.msra.mxu0 %v3615_v63  ;;  %v3710_v63 = vld [vmem:[#allocation9 + $0x1ac] ss:$16 sps:$4 sm:$0xff]  }
 0x191   :  { %1353 = vmatprep.subr.bf16.mxu0 %v3620_v0  ;;  %v3708_v0 = vld [vmem:[#allocation9 + $0x1a8] ss:$16 sps:$4 sm:$0xff]  }
 0x194   :  { %1354 = vmatpush2.bf16.msra.mxu0 %v3618_v1  ;;  %v3716_v1 = vld [vmem:[#allocation9 + $0x18c] ss:$16 sps:$4 sm:$0xff]  }
 0x195   :  { %1971 = vmatprep.subr.bf16.mxu0 %v3650_v44  ;;  %v3701_v44 = vld [vmem:[#allocation9 + $0x1c4] ss:$16 sps:$4 sm:$0xff]  }
 0x217   :  { %v1067_v11 = vpop.f32.mrf.mxu0  ;;  %v1108_v12 = vpop.f32.mrf.mxu1 }
 0x218   :  { %v1068_v13 = vadd.f32 %v1067_v11, %v706_v5  ;;  %v3728_v5 = vld [vmem:[#allocation9 + $0x14c] ss:$16 sps:$4 sm:$0xff]   ;;  %v1151_v11 = vld [vmem:[%s4286_s7] sm:$0x3] }
 0x219   :  { %v1069_v14 = vpop.f32.mrf.mxu0  ;;  %v1110_v15 = vpop.f32.mrf.mxu1 }
 0x21a   :  { %v1109_v16 = vadd.f32 %v1108_v12, %v1068_v13  ;;  %v1070_v17 = vadd.f32 %v1069_v14, %v710_v8  ;;  %v3726_v8 = vld [vmem:[#allocation9 + $0x148] ss:$16 sps:$4 sm:$0xff]   ;;  %v1156_v12 = vrot.slane %v1151_v11, %v4206_v6  ;;  %v1160_v13 = vrot.slane %v1151_v11, %v4213_v9 }
 0x21b   :  { %v1071_v18 = vpop.f32.mrf.mxu0  ;;  %v1112_v19 = vpop.f32.mrf.mxu1 }
 0x21c   :  { %v1111_v20 = vadd.f32 %v1110_v15, %v1070_v17  ;;  %v1115_v21 = vmax.f32 %v1109_v16, 0.0 }
 0x21d   :  { %v1072_v22 = vpop.f32.mrf.mxu0  ;;  %v1113_v23 = vpop.f32.mrf.mxu1 }
 0x21e   :  { %v1116_v24 = vmax.f32 %v1111_v20, 0.0  ;;  %v1117_v26 = vpack.c.bf16 %v1115_v21, %v1115_v21  ;;  %v1366_v22 = vld [vmem:[%s4280_s1] sm:$0xff] }
 0x220   :  { %v1118_v25 = vpack.c.bf16 %v1116_v24, %v1116_v24 }
 0x222   :  { %1355 = vmatprep.mubr.bf16.mxu0 %v1118_v25 }
 0x223   :  { %1356 = vmatmul.mubr.bf16.vlgmr.msra.gmra.mxu0 %v1117_v26  ;;  %v3645_v26 = vld [vmem:[#allocation9 + $0xe0] ss:$16 sps:$4 sm:$0xff]  }
 0x224   :  { %1972 = vmatpush1.bf16.msra.mxu0 %v3648_v43  ;;  %v3693_v43 = vld [vmem:[#allocation9 + $0x1e0] ss:$16 sps:$4 sm:$0xff]  }
 0x225   :  { %1973 = vmatprep.subr.bf16.mxu0 %v3656_v45  ;;  %v3699_v45 = vld [vmem:[#allocation9 + $0x1c0] ss:$16 sps:$4 sm:$0xff]  }
 0x228   :  { %1974 = vmatpush1.bf16.msra.mxu0 %v3654_v46  ;;  %v3707_v46 = vld [vmem:[#allocation9 + $0x1a4] ss:$16 sps:$4 sm:$0xff]  }
 0x229   :  { %1975 = vmatprep.subr.bf16.mxu0 %v3662_v47  ;;  %v3705_v47 = vld [vmem:[#allocation9 + $0x1a0] ss:$16 sps:$4 sm:$0xff]  }
 0x22c   :  { %1976 = vmatpush1.bf16.msra.mxu0 %v3660_v48  ;;  %v3713_v48 = vld [vmem:[#allocation9 + $0x184] ss:$16 sps:$4 sm:$0xff]  }
 0x22d   :  { %1977 = vmatprep.subr.bf16.mxu0 %v3668_v49  ;;  %v3711_v49 = vld [vmem:[#allocation9 + $0x180] ss:$16 sps:$4 sm:$0xff]  }
 0x230   :  { %1978 = vmatpush1.bf16.msra.mxu0 %v3666_v50  ;;  %v3719_v50 = vld [vmem:[#allocation9 + $0x164] ss:$16 sps:$4 sm:$0xff]  }
 0x231   :  { %1979 = vmatprep.subr.bf16.mxu0 %v3674_v51  ;;  %v3717_v51 = vld [vmem:[#allocation9 + $0x160] ss:$16 sps:$4 sm:$0xff]  }
 0x234   :  { %1980 = vmatpush1.bf16.msra.mxu0 %v3672_v52  ;;  %v3725_v52 = vld [vmem:[#allocation9 + $0x144] ss:$16 sps:$4 sm:$0xff]  }
 0x235   :  { %1981 = vmatprep.subr.bf16.mxu0 %v3680_v53  ;;  %v3723_v53 = vld [vmem:[#allocation9 + $0x140] ss:$16 sps:$4 sm:$0xff]  }
 0x238   :  { %1982 = vmatpush1.bf16.msra.mxu0 %v3678_v54  ;;  %v3731_v54 = vld [vmem:[#allocation9 + $0x124] ss:$16 sps:$4 sm:$0xff]  }
 0x239   :  { %1983 = vmatprep.subr.bf16.mxu0 %v3686_v55  ;;  %v3734_v55 = vld [vmem:[#allocation9 + $0x12c] ss:$16 sps:$4 sm:$0xff]  }
 0x23c   :  { %1984 = vmatpush1.bf16.msra.mxu0 %v3684_v56  ;;  %v3729_v56 = vld [vmem:[#allocation9 + $0x120] ss:$16 sps:$4 sm:$0xff]  }
 0x23d   :  { %1985 = vmatprep.subr.bf16.mxu0 %v3692_v57  ;;  %v3732_v57 = vld [vmem:[#allocation9 + $0x128] ss:$16 sps:$4 sm:$0xff]  }
 0x240   :  { %1986 = vmatpush1.bf16.msra.mxu0 %v3690_v58  ;;  %v3737_v58 = vld [vmem:[#allocation9 + $0x104] ss:$16 sps:$4 sm:$0xff]  }
 0x241   :  { %1987 = vmatprep.subr.bf16.mxu0 %v3698_v59  ;;  %v3740_v59 = vld [vmem:[#allocation9 + $0x10c] ss:$16 sps:$4 sm:$0xff]  }
 0x244   :  { %1988 = vmatpush2.bf16.msra.mxu0 %v3696_v60  ;;  %v3735_v60 = vld [vmem:[#allocation9 + $0x100] ss:$16 sps:$4 sm:$0xff]  }
 0x245   :  { %1989 = vmatprep.subr.bf16.mxu0 %v3704_v61  ;;  %v3738_v61 = vld [vmem:[#allocation9 + $0x108] ss:$16 sps:$4 sm:$0xff]  }
 0x248   :  { %1990 = vmatpush2.bf16.msra.mxu0 %v3702_v62  ;;  %v3743_v62 = vld [vmem:[#allocation10 + $0xe4] ss:$16 sps:$4 sm:$0xff]  }
 0x249   :  { %1991 = vmatprep.subr.bf16.mxu0 %v3710_v63  ;;  %v3746_v63 = vld [vmem:[#allocation10 + $0x2e4] ss:$16 sps:$4 sm:$0xff]  }
 0x24c   :  { %1992 = vmatpush2.bf16.msra.mxu0 %v3708_v0  ;;  %v1389_v0 = vld [vmem:[%s4288_s9] sm:$0x3] }
 0x24d   :  { %1993 = vmatprep.subr.bf16.mxu0 %v3716_v1  ;;  %v1394_v1 = vrot.slane %v1389_v0, %v4206_v6 }
 0x250   :  { %1994 = vmatpush2.bf16.msra.mxu0 %v3714_v2  ;;  %v1398_v2 = vrot.slane %v1389_v0, %v4213_v9  ;;  %v3816_v0 = vld [vmem:[#allocation10 + $0x360] ss:$16 sps:$4 sm:$0xff]  }
 0x251   :  { %1995 = vmatprep.subr.bf16.mxu0 %v3722_v3 }
 0x254   :  { %1996 = vmatpush2.bf16.msra.mxu0 %v3720_v4 }
 0x255   :  { %1997 = vmatprep.subr.bf16.mxu0 %v3728_v5 }
 0x258   :  { %1998 = vmatpush2.bf16.msra.mxu0 %v3726_v8 }
 0x259   :  { %1999 = vmatprep.subr.bf16.mxu0 %v3734_v55  ;;  %v3801_v55 = vld [vmem:[#allocation10 + $0x1a0] ss:$16 sps:$4 sm:$0xff]  }
 0x25c   :  { %2000 = vmatpush2.bf16.msra.mxu0 %v3732_v57  ;;  %v3809_v57 = vld [vmem:[#allocation10 + $0x184] ss:$16 sps:$4 sm:$0xff]  }
 0x25d   :  { %2001 = vmatprep.subr.bf16.mxu0 %v3740_v59  ;;  %v3807_v59 = vld [vmem:[#allocation10 + $0x180] ss:$16 sps:$4 sm:$0xff]  }
 0x260   :  { %2002 = vmatpush2.bf16.msra.mxu0 %v3738_v61  ;;  %v3815_v61 = vld [vmem:[#allocation10 + $0x164] ss:$16 sps:$4 sm:$0xff]  }
 0x261   :  { %2851 = vmatprep.subr.bf16.mxu0 %v3746_v63  ;;  %v3813_v63 = vld [vmem:[#allocation10 + $0x160] ss:$16 sps:$4 sm:$0xff]  }
 0x2e3   :  { %v1357_v14 = vpop.f32.mrf.mxu0 }
 0x2e4   :  { %v1358_v15 = vadd.f32 %v1357_v14, %v1156_v12  ;;  %v3744_v14 = vld [vmem:[#allocation10 + $0x2e0] ss:$16 sps:$4 sm:$0xff]  }
 0x2e5   :  { %v1359_v16 = vpop.f32.mrf.mxu0 }
 0x2e6   :  { %1364 = vst [vmem:[%s4293_s14] sm:$0xff] %v1358_v15  ;;  %v1360_v17 = vadd.f32 %v1359_v16, %v1160_v13  ;;  %v3741_v13 = vld [vmem:[#allocation10 + $0xe0] ss:$16 sps:$4 sm:$0xff]  }
 0x2e7   :  { %v1361_v18 = vpop.f32.mrf.mxu0 }
 0x2e8   :  { %1365 = vst [vmem:[%s4294_s15] sm:$0xff] %v1360_v17  ;;  %v1367_v19 = vmul.f32 0.5, %v1360_v17  ;;  %v3749_v17 = vld [vmem:[#allocation10 + $0xc4] ss:$16 sps:$4 sm:$0xff]  }
 0x2e9   :  { %v1362_v20 = vpop.f32.mrf.mxu0  ;;  %v3752_v18 = vld [vmem:[#allocation10 + $0x2c4] ss:$16 sps:$4 sm:$0xff]  }
 0x2ea   :  { %v1368_v21 = vmul.f32 1.442695, %v1367_v19  ;;  %v3747_v19 = vld [vmem:[#allocation10 + $0xc0] ss:$16 sps:$4 sm:$0xff]  }
 0x2eb   :  { %v3750_v20 = vld [vmem:[#allocation10 + $0x2c0] ss:$16 sps:$4 sm:$0xff]  }
 0x2ec   :  { %3933 = vpow2.f32 %v1368_v21  ;;  %v3755_v21 = vld [vmem:[#allocation10 + $0xa4] ss:$16 sps:$4 sm:$0xff]  }
 0x2f9   :  { %v3934_v23 = vpop.eup %3933 }
 0x2fa   :  { %v1370_v24 = vmul.f32 %v3934_v23, %v1366_v22  ;;  %v3758_v22 = vld [vmem:[#allocation10 + $0x2a4] ss:$16 sps:$4 sm:$0xff]   ;;  %v3753_v23 = vld [vmem:[#allocation10 + $0xa0] ss:$16 sps:$4 sm:$0xff]  }
 0x2fc   :  { %v1371_v25 = vadd.f32 %v1370_v24, %v1358_v15  ;;  %v3756_v24 = vld [vmem:[#allocation10 + $0x2a0] ss:$16 sps:$4 sm:$0xff]  }
 0x2fe   :  { %v1372_v27 = vpack.c.bf16 %v1371_v25, %v1371_v25  ;;  %v3761_v25 = vld [vmem:[#allocation10 + $0x84] ss:$16 sps:$4 sm:$0xff]  }
 0x300   :  { %1514 = vmatmul.mubr.bf16.vlgmr.msra.gmra.mxu1 %v1372_v27  ;;  %v3759_v27 = vld [vmem:[#allocation10 + $0x80] ss:$16 sps:$4 sm:$0xff]  }
 0x301   :  { %1931 = vmatpush1.bf16.msra.mxu1 %v3645_v26  ;;  %v3764_v26 = vld [vmem:[#allocation10 + $0x284] ss:$16 sps:$4 sm:$0xff]  }
 0x302   :  { %1932 = vmatprep.subr.bf16.mxu1 %v3653_v28  ;;  %v3762_v28 = vld [vmem:[#allocation10 + $0x280] ss:$16 sps:$4 sm:$0xff]  }
 0x305   :  { %1933 = vmatpush1.bf16.msra.mxu1 %v3651_v29  ;;  %v3767_v29 = vld [vmem:[#allocation10 + $0x64] ss:$16 sps:$4 sm:$0xff]  }
 0x306   :  { %1934 = vmatprep.subr.bf16.mxu1 %v3659_v30  ;;  %v3770_v30 = vld [vmem:[#allocation10 + $0x264] ss:$16 sps:$4 sm:$0xff]  }
 0x309   :  { %1935 = vmatpush1.bf16.msra.mxu1 %v3657_v31  ;;  %v3765_v31 = vld [vmem:[#allocation10 + $0x60] ss:$16 sps:$4 sm:$0xff]  }
 0x30a   :  { %1936 = vmatprep.subr.bf16.mxu1 %v3665_v32  ;;  %v3768_v32 = vld [vmem:[#allocation10 + $0x260] ss:$16 sps:$4 sm:$0xff]  }
 0x30d   :  { %1937 = vmatpush1.bf16.msra.mxu1 %v3663_v33  ;;  %v3773_v33 = vld [vmem:[#allocation10 + $0x44] ss:$16 sps:$4 sm:$0xff]  }
 0x30e   :  { %1938 = vmatprep.subr.bf16.mxu1 %v3671_v34  ;;  %v3776_v34 = vld [vmem:[#allocation10 + $0x244] ss:$16 sps:$4 sm:$0xff]  }
 0x311   :  { %1939 = vmatpush1.bf16.msra.mxu1 %v3669_v35  ;;  %v3771_v35 = vld [vmem:[#allocation10 + $0x40] ss:$16 sps:$4 sm:$0xff]  }
 0x312   :  { %1940 = vmatprep.subr.bf16.mxu1 %v3677_v36  ;;  %v3774_v36 = vld [vmem:[#allocation10 + $0x240] ss:$16 sps:$4 sm:$0xff]  }
 0x315   :  { %1941 = vmatpush1.bf16.msra.mxu1 %v3675_v37  ;;  %v3779_v37 = vld [vmem:[#allocation10 + $0x24] ss:$16 sps:$4 sm:$0xff]  }
 0x316   :  { %1942 = vmatprep.subr.bf16.mxu1 %v3683_v38  ;;  %v3782_v38 = vld [vmem:[#allocation10 + $0x224] ss:$16 sps:$4 sm:$0xff]  }
 0x319   :  { %1943 = vmatpush1.bf16.msra.mxu1 %v3681_v39  ;;  %v3777_v39 = vld [vmem:[#allocation10 + $0x20] ss:$16 sps:$4 sm:$0xff]  }
 0x31a   :  { %1944 = vmatprep.subr.bf16.mxu1 %v3689_v40  ;;  %v3780_v40 = vld [vmem:[#allocation10 + $0x220] ss:$16 sps:$4 sm:$0xff]  }
 0x31d   :  { %1945 = vmatpush1.bf16.msra.mxu1 %v3687_v41  ;;  %v3785_v41 = vld [vmem:[#allocation10 + $0x4] ss:$16 sps:$4 sm:$0xff]  }
 0x31e   :  { %1946 = vmatprep.subr.bf16.mxu1 %v3695_v42  ;;  %v3788_v42 = vld [vmem:[#allocation10 + $0x204] ss:$16 sps:$4 sm:$0xff]  }
 0x321   :  { %1947 = vmatpush2.bf16.msra.mxu1 %v3693_v43  ;;  %v3783_v43 = vld [vmem:[#allocation10] ss:$16 sps:$4 sm:$0xff]  }
 0x322   :  { %1948 = vmatprep.subr.bf16.mxu1 %v3701_v44  ;;  %v3786_v44 = vld [vmem:[#allocation10 + $0x200] ss:$16 sps:$4 sm:$0xff]  }
 0x325   :  { %1949 = vmatpush2.bf16.msra.mxu1 %v3699_v45  ;;  %v3791_v45 = vld [vmem:[#allocation10 + $0x1e4] ss:$16 sps:$4 sm:$0xff]  }
 0x326   :  { %1950 = vmatprep.subr.bf16.mxu1 %v3707_v46  ;;  %v3794_v46 = vld [vmem:[#allocation10 + $0x3e4] ss:$16 sps:$4 sm:$0xff]  }
 0x329   :  { %1951 = vmatpush2.bf16.msra.mxu1 %v3705_v47  ;;  %v3789_v47 = vld [vmem:[#allocation10 + $0x1e0] ss:$16 sps:$4 sm:$0xff]  }
 0x32a   :  { %1952 = vmatprep.subr.bf16.mxu1 %v3713_v48  ;;  %v3792_v48 = vld [vmem:[#allocation10 + $0x3e0] ss:$16 sps:$4 sm:$0xff]  }
 0x32d   :  { %1953 = vmatpush2.bf16.msra.mxu1 %v3711_v49  ;;  %v3797_v49 = vld [vmem:[#allocation10 + $0x1c4] ss:$16 sps:$4 sm:$0xff]  }
 0x32e   :  { %1954 = vmatprep.subr.bf16.mxu1 %v3719_v50  ;;  %v3800_v50 = vld [vmem:[#allocation10 + $0x3c4] ss:$16 sps:$4 sm:$0xff]  }
 0x331   :  { %1955 = vmatpush2.bf16.msra.mxu1 %v3717_v51  ;;  %v3795_v51 = vld [vmem:[#allocation10 + $0x1c0] ss:$16 sps:$4 sm:$0xff]  }
 0x332   :  { %1956 = vmatprep.subr.bf16.mxu1 %v3725_v52  ;;  %v3798_v52 = vld [vmem:[#allocation10 + $0x3c0] ss:$16 sps:$4 sm:$0xff]  }
 0x335   :  { %1957 = vmatpush2.bf16.msra.mxu1 %v3723_v53  ;;  %v3803_v53 = vld [vmem:[#allocation10 + $0x1a4] ss:$16 sps:$4 sm:$0xff]  }
 0x336   :  { %1958 = vmatprep.subr.bf16.mxu1 %v3731_v54  ;;  %v3806_v54 = vld [vmem:[#allocation10 + $0x3a4] ss:$16 sps:$4 sm:$0xff]  }
 0x339   :  { %1959 = vmatpush2.bf16.msra.mxu1 %v3729_v56  ;;  %v3804_v56 = vld [vmem:[#allocation10 + $0x3a0] ss:$16 sps:$4 sm:$0xff]  }
 0x33a   :  { %1960 = vmatprep.subr.bf16.mxu1 %v3737_v58  ;;  %v3812_v58 = vld [vmem:[#allocation10 + $0x384] ss:$16 sps:$4 sm:$0xff]  }
 0x33d   :  { %1961 = vmatpush2.bf16.msra.mxu1 %v3735_v60  ;;  %v3810_v60 = vld [vmem:[#allocation10 + $0x380] ss:$16 sps:$4 sm:$0xff]  }
 0x33e   :  { %2810 = vmatprep.subr.bf16.mxu1 %v3743_v62  ;;  %v3818_v62 = vld [vmem:[#allocation10 + $0x364] ss:$16 sps:$4 sm:$0xff]  }
 0x3c0   :  { %v1515_v3 = vpop.f32.mrf.mxu1 }
 0x3c1   :  { %v1516_v4 = vadd.f32 %v1515_v3, %v1394_v1  ;;  %v3821_v1 = vld [vmem:[#allocation10 + $0x144] ss:$16 sps:$4 sm:$0xff]   ;;  %v3819_v3 = vld [vmem:[#allocation10 + $0x140] ss:$16 sps:$4 sm:$0xff]  }
 0x3c2   :  { %v1517_v5 = vpop.f32.mrf.mxu1 }
 0x3c3   :  { %v1518_v8 = vadd.f32 %v1517_v5, %v1398_v2  ;;  %v1522_v15 = vpack.c.bf16 %v1516_v4, %v1516_v4  ;;  %v3824_v2 = vld [vmem:[#allocation10 + $0x344] ss:$16 sps:$4 sm:$0xff]   ;;  %v3822_v4 = vld [vmem:[#allocation10 + $0x340] ss:$16 sps:$4 sm:$0xff]  }
 0x3c4   :  { %v1519_v11 = vpop.f32.mrf.mxu1  ;;  %v3827_v5 = vld [vmem:[#allocation10 + $0x124] ss:$16 sps:$4 sm:$0xff]  }
 0x3c5   :  { %v1523_v12 = vpack.c.bf16 %v1518_v8, %v1518_v8  ;;  %v3830_v8 = vld [vmem:[#allocation10 + $0x324] ss:$16 sps:$4 sm:$0xff]   ;;  %v3825_v11 = vld [vmem:[#allocation10 + $0x120] ss:$16 sps:$4 sm:$0xff]  }
 0x3c6   :  { %v1520_v16 = vpop.f32.mrf.mxu1 }
 0x3c7   :  { %1962 = vmatprep.mubr.bf16.mxu1 %v1523_v12  ;;  %2003 = vmatprep.mubr.bf16.mxu0 %v1523_v12  ;;  %v3828_v12 = vld [vmem:[#allocation10 + $0x320] ss:$16 sps:$4 sm:$0xff]  }
 0x3c8   :  { %1963 = vmatmul.mubr.bf16.vlgmr.msra.gmra.mxu1 %v1522_v15  ;;  %2004 = vmatmul.mubr.bf16.vlgmr.msra.gmra.mxu0 %v1522_v15  ;;  %v3831_v15 = vld [vmem:[#allocation10 + $0x100] ss:$16 sps:$4 sm:$0xff]  }
 0x3c9   :  { %2811 = vmatpush1.bf16.msra.mxu1 %v3741_v13  ;;  %2852 = vmatpush1.bf16.msra.mxu0 %v3744_v14  ;;  %v3833_v13 = vld [vmem:[#allocation10 + $0x104] ss:$16 sps:$4 sm:$0xff]   ;;  %v3834_v16 = vld [vmem:[#allocation10 + $0x300] ss:$16 sps:$4 sm:$0xff]  }
 0x3ca   :  { %2812 = vmatprep.subr.bf16.mxu1 %v3749_v17  ;;  %2853 = vmatprep.subr.bf16.mxu0 %v3752_v18  ;;  %v3836_v14 = vld [vmem:[#allocation10 + $0x304] ss:$16 sps:$4 sm:$0xff]   ;;  %v3839_v17 = vld [vmem:[#allocation10 + $0xec] ss:$16 sps:$4 sm:$0xff]  }
 0x3cb   :  { %v3842_v18 = vld [vmem:[#allocation10 + $0x2ec] ss:$16 sps:$4 sm:$0xff]  }
 0x3cd   :  { %2813 = vmatpush1.bf16.msra.mxu1 %v3747_v19  ;;  %2854 = vmatpush1.bf16.msra.mxu0 %v3750_v20  ;;  %v1588_v19 = vld [vmem:[%s4290_s11] sm:$0xf] }
 0x3ce   :  { %2814 = vmatprep.subr.bf16.mxu1 %v3755_v21  ;;  %2855 = vmatprep.subr.bf16.mxu0 %v3758_v22  ;;  %v1593_v20 = vrot.slane %v1588_v19, %v4206_v6  ;;  %v1601_v21 = vrot.slane %v1588_v19, %v4208_v7  ;;  %v1597_v22 = vrot.slane %v1588_v19, %v4213_v9 }
 0x3d1   :  { %2815 = vmatpush1.bf16.msra.mxu1 %v3753_v23  ;;  %2856 = vmatpush1.bf16.msra.mxu0 %v3756_v24  ;;  %v1605_v23 = vrot.slane %v1588_v19, %v4215_v10  ;;  %v3896_v19 = vld [vmem:[#allocation10 + $0x3cc] ss:$16 sps:$4 sm:$0xff]  }
 0x3d2   :  { %2816 = vmatprep.subr.bf16.mxu1 %v3761_v25  ;;  %2857 = vmatprep.subr.bf16.mxu0 %v3764_v26 }
 0x3d5   :  { %2817 = vmatpush1.bf16.msra.mxu1 %v3759_v27  ;;  %2858 = vmatpush1.bf16.msra.mxu0 %v3762_v28 }
 0x3d6   :  { %2818 = vmatprep.subr.bf16.mxu1 %v3767_v29  ;;  %2859 = vmatprep.subr.bf16.mxu0 %v3770_v30 }
 0x3d9   :  { %2819 = vmatpush1.bf16.msra.mxu1 %v3765_v31  ;;  %2860 = vmatpush1.bf16.msra.mxu0 %v3768_v32 }
 0x3da   :  { %2820 = vmatprep.subr.bf16.mxu1 %v3773_v33  ;;  %2861 = vmatprep.subr.bf16.mxu0 %v3776_v34 }
 0x3dd   :  { %2821 = vmatpush1.bf16.msra.mxu1 %v3771_v35  ;;  %2862 = vmatpush1.bf16.msra.mxu0 %v3774_v36 }
 0x3de   :  { %2822 = vmatprep.subr.bf16.mxu1 %v3779_v37  ;;  %2863 = vmatprep.subr.bf16.mxu0 %v3782_v38 }
 0x3e1   :  { %2823 = vmatpush1.bf16.msra.mxu1 %v3777_v39  ;;  %2864 = vmatpush1.bf16.msra.mxu0 %v3780_v40 }
 0x3e2   :  { %2824 = vmatprep.subr.bf16.mxu1 %v3785_v41  ;;  %2865 = vmatprep.subr.bf16.mxu0 %v3788_v42  ;;  %v3837_v42 = vld [vmem:[#allocation10 + $0xe8] ss:$16 sps:$4 sm:$0xff]  }
 0x3e5   :  { %2825 = vmatpush1.bf16.msra.mxu1 %v3783_v43  ;;  %2866 = vmatpush1.bf16.msra.mxu0 %v3786_v44  ;;  %v3840_v43 = vld [vmem:[#allocation10 + $0x2e8] ss:$16 sps:$4 sm:$0xff]  }
 0x3e6   :  { %2826 = vmatprep.subr.bf16.mxu1 %v3791_v45  ;;  %2867 = vmatprep.subr.bf16.mxu0 %v3794_v46  ;;  %v3845_v46 = vld [vmem:[#allocation10 + $0xcc] ss:$16 sps:$4 sm:$0xff]  }
 0x3e9   :  { %2827 = vmatpush2.bf16.msra.mxu1 %v3789_v47  ;;  %2868 = vmatpush2.bf16.msra.mxu0 %v3792_v48  ;;  %v3848_v47 = vld [vmem:[#allocation10 + $0x2cc] ss:$16 sps:$4 sm:$0xff]   ;;  %v3843_v48 = vld [vmem:[#allocation10 + $0xc8] ss:$16 sps:$4 sm:$0xff]  }
 0x3ea   :  { %2828 = vmatprep.subr.bf16.mxu1 %v3797_v49  ;;  %2869 = vmatprep.subr.bf16.mxu0 %v3800_v50  ;;  %v3846_v49 = vld [vmem:[#allocation10 + $0x2c8] ss:$16 sps:$4 sm:$0xff]   ;;  %v3851_v50 = vld [vmem:[#allocation10 + $0xac] ss:$16 sps:$4 sm:$0xff]  }
 0x3ed   :  { %2829 = vmatpush2.bf16.msra.mxu1 %v3795_v51  ;;  %2870 = vmatpush2.bf16.msra.mxu0 %v3798_v52  ;;  %v3854_v51 = vld [vmem:[#allocation10 + $0x2ac] ss:$16 sps:$4 sm:$0xff]   ;;  %v3849_v52 = vld [vmem:[#allocation10 + $0xa8] ss:$16 sps:$4 sm:$0xff]  }
 0x3ee   :  { %2830 = vmatprep.subr.bf16.mxu1 %v3803_v53  ;;  %2871 = vmatprep.subr.bf16.mxu0 %v3806_v54  ;;  %v3852_v53 = vld [vmem:[#allocation10 + $0x2a8] ss:$16 sps:$4 sm:$0xff]   ;;  %v3857_v54 = vld [vmem:[#allocation10 + $0x8c] ss:$16 sps:$4 sm:$0xff]  }
 0x3f1   :  { %2831 = vmatpush2.bf16.msra.mxu1 %v3801_v55  ;;  %2872 = vmatpush2.bf16.msra.mxu0 %v3804_v56  ;;  %v3860_v55 = vld [vmem:[#allocation10 + $0x28c] ss:$16 sps:$4 sm:$0xff]   ;;  %v3855_v56 = vld [vmem:[#allocation10 + $0x88] ss:$16 sps:$4 sm:$0xff]  }
 0x3f2   :  { %2832 = vmatprep.subr.bf16.mxu1 %v3809_v57  ;;  %2873 = vmatprep.subr.bf16.mxu0 %v3812_v58  ;;  %v3858_v57 = vld [vmem:[#allocation10 + $0x288] ss:$16 sps:$4 sm:$0xff]   ;;  %v3863_v58 = vld [vmem:[#allocation10 + $0x6c] ss:$16 sps:$4 sm:$0xff]  }
 0x3f5   :  { %2833 = vmatpush2.bf16.msra.mxu1 %v3807_v59  ;;  %2874 = vmatpush2.bf16.msra.mxu0 %v3810_v60  ;;  %v3866_v59 = vld [vmem:[#allocation10 + $0x26c] ss:$16 sps:$4 sm:$0xff]   ;;  %v3861_v60 = vld [vmem:[#allocation10 + $0x68] ss:$16 sps:$4 sm:$0xff]  }
 0x3f6   :  { %2834 = vmatprep.subr.bf16.mxu1 %v3815_v61  ;;  %2875 = vmatprep.subr.bf16.mxu0 %v3818_v62  ;;  %v3864_v61 = vld [vmem:[#allocation10 + $0x268] ss:$16 sps:$4 sm:$0xff]   ;;  %v3869_v62 = vld [vmem:[#allocation10 + $0x4c] ss:$16 sps:$4 sm:$0xff]  }
 0x3f9   :  { %2835 = vmatpush2.bf16.msra.mxu1 %v3813_v63  ;;  %2876 = vmatpush2.bf16.msra.mxu0 %v3816_v0  ;;  %v3872_v63 = vld [vmem:[#allocation10 + $0x24c] ss:$16 sps:$4 sm:$0xff]   ;;  %v3867_v0 = vld [vmem:[#allocation10 + $0x48] ss:$16 sps:$4 sm:$0xff]  }
 0x3fa   :  { %2836 = vmatprep.subr.bf16.mxu1 %v3821_v1  ;;  %2877 = vmatprep.subr.bf16.mxu0 %v3824_v2  ;;  %v3870_v1 = vld [vmem:[#allocation10 + $0x248] ss:$16 sps:$4 sm:$0xff]   ;;  %v3875_v2 = vld [vmem:[#allocation10 + $0x2c] ss:$16 sps:$4 sm:$0xff]  }
 0x3fd   :  { %2837 = vmatpush2.bf16.msra.mxu1 %v3819_v3  ;;  %2878 = vmatpush2.bf16.msra.mxu0 %v3822_v4  ;;  %v3878_v3 = vld [vmem:[#allocation10 + $0x22c] ss:$16 sps:$4 sm:$0xff]   ;;  %v3873_v4 = vld [vmem:[#allocation10 + $0x28] ss:$16 sps:$4 sm:$0xff]  }
 0x3fe   :  { %2838 = vmatprep.subr.bf16.mxu1 %v3827_v5  ;;  %2879 = vmatprep.subr.bf16.mxu0 %v3830_v8  ;;  %v3876_v5 = vld [vmem:[#allocation10 + $0x228] ss:$16 sps:$4 sm:$0xff]   ;;  %v3881_v8 = vld [vmem:[#allocation10 + $0xc] ss:$16 sps:$4 sm:$0xff]  }
 0x401   :  { %2839 = vmatpush2.bf16.msra.mxu1 %v3825_v11  ;;  %2880 = vmatpush2.bf16.msra.mxu0 %v3828_v12  ;;  %v3884_v11 = vld [vmem:[#allocation10 + $0x20c] ss:$16 sps:$4 sm:$0xff]   ;;  %v3879_v12 = vld [vmem:[#allocation10 + $0x8] ss:$16 sps:$4 sm:$0xff]  }
 0x402   :  { %2840 = vmatprep.subr.bf16.mxu1 %v3833_v13  ;;  %2881 = vmatprep.subr.bf16.mxu0 %v3836_v14  ;;  %v3882_v13 = vld [vmem:[#allocation10 + $0x208] ss:$16 sps:$4 sm:$0xff]   ;;  %v3887_v14 = vld [vmem:[#allocation10 + $0x1ec] ss:$16 sps:$4 sm:$0xff]  }
 0x405   :  { %2841 = vmatpush2.bf16.msra.mxu1 %v3831_v15  ;;  %2882 = vmatpush2.bf16.msra.mxu0 %v3834_v16  ;;  %v3890_v15 = vld [vmem:[#allocation10 + $0x3ec] ss:$16 sps:$4 sm:$0xff]   ;;  %v3885_v16 = vld [vmem:[#allocation10 + $0x1e8] ss:$16 sps:$4 sm:$0xff]  }
 0x406   :  { %2892 = vmatprep.subr.bf16.mxu1 %v3839_v17  ;;  %2933 = vmatprep.subr.bf16.mxu0 %v3842_v18  ;;  %v3888_v17 = vld [vmem:[#allocation10 + $0x3e8] ss:$16 sps:$4 sm:$0xff]   ;;  %v3893_v18 = vld [vmem:[#allocation10 + $0x1cc] ss:$16 sps:$4 sm:$0xff]  }
 0x488   :  { %v1964_v24 = vpop.f32.mrf.mxu1  ;;  %v2005_v25 = vpop.f32.mrf.mxu0 }
 0x489   :  { %v1965_v26 = vadd.f32 %v1964_v24, %v1593_v20  ;;  %v2006_v27 = vadd.f32 %v2005_v25, %v1601_v21  ;;  %v3891_v20 = vld [vmem:[#allocation10 + $0x1c8] ss:$16 sps:$4 sm:$0xff]  }
 0x48a   :  { %v1966_v28 = vpop.f32.mrf.mxu1  ;;  %v2007_v29 = vpop.f32.mrf.mxu0  ;;  %v3894_v21 = vld [vmem:[#allocation10 + $0x3c8] ss:$16 sps:$4 sm:$0xff]  }
 0x48b   :  { %v1967_v30 = vadd.f32 %v1966_v28, %v1597_v22  ;;  %v2008_v31 = vadd.f32 %v2007_v29, %v1605_v23  ;;  %v2012_v32 = vmax.f32 %v1965_v26, 0.0  ;;  %v2014_v33 = vmax.f32 %v2006_v27, 0.0  ;;  %v3899_v22 = vld [vmem:[#allocation10 + $0x1ac] ss:$16 sps:$4 sm:$0xff]   ;;  %v3897_v24 = vld [vmem:[#allocation10 + $0x1a8] ss:$16 sps:$4 sm:$0xff]  }
 0x48c   :  { %v1968_v34 = vpop.f32.mrf.mxu1  ;;  %v2009_v35 = vpop.f32.mrf.mxu0  ;;  %v3902_v23 = vld [vmem:[#allocation10 + $0x3ac] ss:$16 sps:$4 sm:$0xff]   ;;  %v3900_v25 = vld [vmem:[#allocation10 + $0x3a8] ss:$16 sps:$4 sm:$0xff]  }
 0x48d   :  { %v2013_v36 = vmax.f32 %v1967_v30, 0.0  ;;  %v2015_v37 = vmax.f32 %v2008_v31, 0.0  ;;  %v4252_v44 = vpack.c.bf16 %v2012_v32, %v2012_v32  ;;  %v4254_v45 = vpack.c.bf16 %v2014_v33, %v2014_v33  ;;  %v3905_v26 = vld [vmem:[#allocation10 + $0x18c] ss:$16 sps:$4 sm:$0xff]   ;;  %v3903_v28 = vld [vmem:[#allocation10 + $0x188] ss:$16 sps:$4 sm:$0xff]  }
 0x48e   :  { %v1969_v38 = vpop.f32.mrf.mxu1  ;;  %v2010_v39 = vpop.f32.mrf.mxu0  ;;  %v3908_v27 = vld [vmem:[#allocation10 + $0x38c] ss:$16 sps:$4 sm:$0xff]   ;;  %v3906_v29 = vld [vmem:[#allocation10 + $0x388] ss:$16 sps:$4 sm:$0xff]  }
 0x48f   :  { %v2017_v40 = vpack.c.bf16 %v2013_v36, %v2013_v36  ;;  %v2019_v41 = vpack.c.bf16 %v2015_v37, %v2015_v37  ;;  %v3911_v30 = vld [vmem:[#allocation10 + $0x16c] ss:$16 sps:$4 sm:$0xff]   ;;  %v3909_v32 = vld [vmem:[#allocation10 + $0x168] ss:$16 sps:$4 sm:$0xff]  }
 0x490   :  { %v3914_v31 = vld [vmem:[#allocation10 + $0x36c] ss:$16 sps:$4 sm:$0xff]   ;;  %v3912_v33 = vld [vmem:[#allocation10 + $0x368] ss:$16 sps:$4 sm:$0xff]  }
 0x491   :  { %2842 = vmatprep.mubr.bf16.mxu1 %v2017_v40  ;;  %2883 = vmatprep.mubr.bf16.mxu0 %v2019_v41  ;;  %v3917_v34 = vld [vmem:[#allocation10 + $0x14c] ss:$16 sps:$4 sm:$0xff]   ;;  %v3915_v36 = vld [vmem:[#allocation10 + $0x148] ss:$16 sps:$4 sm:$0xff]  }
 0x492   :  { %2843 = vmatmul.mubr.bf16.vlgmr.msra.gmra.mxu1 %v4252_v44  ;;  %2884 = vmatmul.mubr.bf16.vlgmr.msra.gmra.mxu0 %v4254_v45  ;;  %v3920_v35 = vld [vmem:[#allocation10 + $0x34c] ss:$16 sps:$4 sm:$0xff]   ;;  %v3918_v37 = vld [vmem:[#allocation10 + $0x348] ss:$16 sps:$4 sm:$0xff]  }
 0x493   :  { %2893 = vmatpush1.bf16.msra.mxu1 %v3837_v42  ;;  %2934 = vmatpush1.bf16.msra.mxu0 %v3840_v43  ;;  %v3923_v38 = vld [vmem:[#allocation10 + $0x12c] ss:$16 sps:$4 sm:$0xff]  }
 0x494   :  { %2924 = vmatprep.mubr.bf16.mxu1 %v2017_v40  ;;  %2965 = vmatprep.mubr.bf16.mxu0 %v2019_v41  ;;  %v3926_v39 = vld [vmem:[#allocation10 + $0x32c] ss:$16 sps:$4 sm:$0xff]   ;;  %v3921_v40 = vld [vmem:[#allocation10 + $0x128] ss:$16 sps:$4 sm:$0xff]  }
 0x495   :  { %2894 = vmatprep.subr.bf16.mxu1 %v3845_v46  ;;  %2935 = vmatprep.subr.bf16.mxu0 %v3848_v47  ;;  %v3924_v41 = vld [vmem:[#allocation10 + $0x328] ss:$16 sps:$4 sm:$0xff]   ;;  %v3929_v42 = vld [vmem:[#allocation10 + $0x10c] ss:$16 sps:$4 sm:$0xff]  }
 0x496   :  { %v3932_v43 = vld [vmem:[#allocation10 + $0x30c] ss:$16 sps:$4 sm:$0xff]   ;;  %v3927_v46 = vld [vmem:[#allocation10 + $0x108] ss:$16 sps:$4 sm:$0xff]  }
 0x497   :  { %2895 = vmatpush1.bf16.msra.mxu1 %v3843_v48  ;;  %2936 = vmatpush1.bf16.msra.mxu0 %v3846_v49  ;;  %v3930_v47 = vld [vmem:[#allocation10 + $0x308] ss:$16 sps:$4 sm:$0xff]   ;;  %v2148_v48 = vld [vmem:[%s4292_s13] sm:$0xf] }
 0x498   :  { %2896 = vmatprep.subr.bf16.mxu1 %v3851_v50  ;;  %2937 = vmatprep.subr.bf16.mxu0 %v3854_v51  ;;  %v2153_v49 = vrot.slane %v2148_v48, %v4206_v6  ;;  %v2157_v50 = vrot.slane %v2148_v48, %v4213_v9  ;;  %v2161_v9 = vrot.slane %v2148_v48, %v4208_v7 }
 0x49b   :  { %2897 = vmatpush1.bf16.msra.mxu1 %v3849_v52  ;;  %2938 = vmatpush1.bf16.msra.mxu0 %v3852_v53 }
 0x49c   :  { %2898 = vmatprep.subr.bf16.mxu1 %v3857_v54  ;;  %2939 = vmatprep.subr.bf16.mxu0 %v3860_v55 }
 0x49f   :  { %2899 = vmatpush1.bf16.msra.mxu1 %v3855_v56  ;;  %2940 = vmatpush1.bf16.msra.mxu0 %v3858_v57 }
 0x4a0   :  { %2900 = vmatprep.subr.bf16.mxu1 %v3863_v58  ;;  %2941 = vmatprep.subr.bf16.mxu0 %v3866_v59 }
 0x4a3   :  { %2901 = vmatpush1.bf16.msra.mxu1 %v3861_v60  ;;  %2942 = vmatpush1.bf16.msra.mxu0 %v3864_v61 }
 0x4a4   :  { %2902 = vmatprep.subr.bf16.mxu1 %v3869_v62  ;;  %2943 = vmatprep.subr.bf16.mxu0 %v3872_v63  ;;  %v2165_v62 = vrot.slane %v2148_v48, %v4215_v10 }
 0x4a7   :  { %2903 = vmatpush1.bf16.msra.mxu1 %v3867_v0  ;;  %2944 = vmatpush1.bf16.msra.mxu0 %v3870_v1 }
 0x4a8   :  { %2904 = vmatprep.subr.bf16.mxu1 %v3875_v2  ;;  %2945 = vmatprep.subr.bf16.mxu0 %v3878_v3 }
 0x4ab   :  { %2905 = vmatpush1.bf16.msra.mxu1 %v3873_v4  ;;  %2946 = vmatpush1.bf16.msra.mxu0 %v3876_v5 }
 0x4ac   :  { %2906 = vmatprep.subr.bf16.mxu1 %v3881_v8  ;;  %2947 = vmatprep.subr.bf16.mxu0 %v3884_v11 }
 0x4af   :  { %2907 = vmatpush1.bf16.msra.mxu1 %v3879_v12  ;;  %2948 = vmatpush1.bf16.msra.mxu0 %v3882_v13 }
 0x4b0   :  { %2908 = vmatprep.subr.bf16.mxu1 %v3887_v14  ;;  %2949 = vmatprep.subr.bf16.mxu0 %v3890_v15 }
 0x4b3   :  { %2909 = vmatpush2.bf16.msra.mxu1 %v3885_v16  ;;  %2950 = vmatpush2.bf16.msra.mxu0 %v3888_v17 }
 0x4b4   :  { %2910 = vmatprep.subr.bf16.mxu1 %v3893_v18  ;;  %2951 = vmatprep.subr.bf16.mxu0 %v3896_v19 }
 0x4b7   :  { %2911 = vmatpush2.bf16.msra.mxu1 %v3891_v20  ;;  %2952 = vmatpush2.bf16.msra.mxu0 %v3894_v21 }
 0x4b8   :  { %2912 = vmatprep.subr.bf16.mxu1 %v3899_v22  ;;  %2953 = vmatprep.subr.bf16.mxu0 %v3902_v23 }
 0x4bb   :  { %2913 = vmatpush2.bf16.msra.mxu1 %v3897_v24  ;;  %2954 = vmatpush2.bf16.msra.mxu0 %v3900_v25 }
 0x4bc   :  { %2914 = vmatprep.subr.bf16.mxu1 %v3905_v26  ;;  %2955 = vmatprep.subr.bf16.mxu0 %v3908_v27 }
 0x4bf   :  { %2915 = vmatpush2.bf16.msra.mxu1 %v3903_v28  ;;  %2956 = vmatpush2.bf16.msra.mxu0 %v3906_v29 }
 0x4c0   :  { %2916 = vmatprep.subr.bf16.mxu1 %v3911_v30  ;;  %2957 = vmatprep.subr.bf16.mxu0 %v3914_v31 }
 0x4c3   :  { %2917 = vmatpush2.bf16.msra.mxu1 %v3909_v32  ;;  %2958 = vmatpush2.bf16.msra.mxu0 %v3912_v33 }
 0x4c4   :  { %2918 = vmatprep.subr.bf16.mxu1 %v3917_v34  ;;  %2959 = vmatprep.subr.bf16.mxu0 %v3920_v35 }
 0x4c7   :  { %2919 = vmatpush2.bf16.msra.mxu1 %v3915_v36  ;;  %2960 = vmatpush2.bf16.msra.mxu0 %v3918_v37 }
 0x4c8   :  { %2920 = vmatprep.subr.bf16.mxu1 %v3923_v38  ;;  %2961 = vmatprep.subr.bf16.mxu0 %v3926_v39 }
 0x4cb   :  { %2921 = vmatpush2.bf16.msra.mxu1 %v3921_v40  ;;  %2962 = vmatpush2.bf16.msra.mxu0 %v3924_v41 }
 0x4cc   :  { %2922 = vmatprep.subr.bf16.mxu1 %v3929_v42  ;;  %2963 = vmatprep.subr.bf16.mxu0 %v3932_v43 }
 0x4cf   :  { %2923 = vmatpush2.bf16.msra.mxu1 %v3927_v46  ;;  %2964 = vmatpush2.bf16.msra.mxu0 %v3930_v47 }
 0x4d2   :  { %2925 = vmatmul.mubr.bf16.vlgmr.msra.gmra.mxu1 %v4252_v44  ;;  %2966 = vmatmul.mubr.bf16.vlgmr.msra.gmra.mxu0 %v4254_v45 }
 0x552   :  { %v2844_v51 = vpop.f32.mrf.mxu1  ;;  %v2885_v52 = vpop.f32.mrf.mxu0 }
 0x553   :  { %v2845_v53 = vadd.f32 %v2844_v51, %v2153_v49 }
 0x554   :  { %v2846_v54 = vpop.f32.mrf.mxu1  ;;  %v2887_v55 = vpop.f32.mrf.mxu0 }
 0x555   :  { %v2886_v56 = vadd.f32 %v2885_v52, %v2845_v53  ;;  %v2847_v57 = vadd.f32 %v2846_v54, %v2157_v50 }
 0x556   :  { %v2848_v58 = vpop.f32.mrf.mxu1  ;;  %v2889_v59 = vpop.f32.mrf.mxu0 }
 0x557   :  { %3935 = vtanh.f32 %v2886_v56  ;;  %v2888_v44 = vadd.f32 %v2887_v55, %v2847_v57 }
 0x558   :  { %v2849_v45 = vpop.f32.mrf.mxu1  ;;  %v2890_v60 = vpop.f32.mrf.mxu0 }
 0x559   :  { %3937 = vtanh.f32 %v2888_v44 }
 0x564   :  { %v3936_v61 = vpop.eup %3935 }
 0x565   :  { %2978 = vst [vmem:[%s4295_s16] sm:$0xff] %v3936_v61 }
 0x566   :  { %v3938_v6 = vpop.eup %3937 }
 0x567   :  { %2979 = vst [vmem:[%s4295_s16 + $0x8] sm:$0xff] %v3938_v6 }
 0x592   :  { %v2926_v63 = vpop.f32.mrf.mxu1  ;;  %v2967_v0 = vpop.f32.mrf.mxu0 }
 0x593   :  { %v2927_v1 = vadd.f32 %v2926_v63, %v2161_v9 }
 0x594   :  { %v2928_v2 = vpop.f32.mrf.mxu1  ;;  %v2969_v3 = vpop.f32.mrf.mxu0 }
 0x595   :  { %v2968_v4 = vadd.f32 %v2967_v0, %v2927_v1  ;;  %v2929_v5 = vadd.f32 %v2928_v2, %v2165_v62 }
 0x596   :  { %v2930_v8 = vpop.f32.mrf.mxu1  ;;  %v2971_v11 = vpop.f32.mrf.mxu0 }
 0x597   :  { %3939 = vtanh.f32 %v2968_v4  ;;  %v2970_v12 = vadd.f32 %v2969_v3, %v2929_v5 }
 0x598   :  { %v2931_v13 = vpop.f32.mrf.mxu1  ;;  %v2972_v14 = vpop.f32.mrf.mxu0 }
 0x599   :  { %3941 = vtanh.f32 %v2970_v12 }
 0x5a4   :  { %v3940_v15 = vpop.eup %3939 }
 0x5a5   :  { %2980 = vst [vmem:[%s4295_s16 + $0x10] sm:$0xff] %v3940_v15 }
 0x5a6   :  { %v3942_v7 = vpop.eup %3941 }
 0x5a7   :  { %2981 = vst [vmem:[%s4295_s16 + $0x18] sm:$0xff] %v3942_v7 }
 0x5a8   :  { %2994 = vsyncpa [#allocation3], 1 }
 0x5a9   :  { %2995 = vsyncpa [#allocation5], 1 }
 0x5aa   :  { %2996 = vsyncpa [#allocation8], 1 }
 0x5ab   :  { %2997 = vsyncpa [#allocation11], 1 }

</bundles_post_ra>
